<compile_context>
chip_gen: v5e
topology: v5e:2x2
jax: 0.10.0
libtpu: 0.0.40
codegen_flags: <defaults>
</compile_context>

<pallas_src>
import functools
import math

import jax
import jax.numpy as jnp
from jax.experimental import pallas as pl
from jax.experimental.pallas import tpu as pltpu


def _cross_att_spe_kernel(
    x_ref, y_ref,            # (1, C, N) f32
    p_ref,                   # (C, C)  group-averaging matrix
    gamma_ref, beta_ref,     # (C, 1)  GroupNorm affine
    wq1_ref, wk1_ref,        # (C, C)  qkv_1 slices (Q rows, K rows)
    wv2_ref,                 # (C, C)  qkv_2 slice  (V rows)
    wproj_ref, bproj_ref,    # (C, C), (C, 1)
    out_ref,                 # (1, C, N)
    *, num_heads: int, att_scale: float, eps: float,
):
    C = x_ref.shape[1]
    N = x_ref.shape[2]
    H = num_heads
    D = C // H

    x = x_ref[0]                      # (C, N) original x (residual)
    y = y_ref[0]

    P = p_ref[...]                    # (C, C)
    gamma = gamma_ref[...]            # (C, 1)
    beta = beta_ref[...]

    def group_norm(v):
        # P @ v averages channels within the same group at every position.
        gm = jnp.dot(P, v, preferred_element_type=jnp.float32)        # (C, N)
        gm2 = jnp.dot(P, v * v, preferred_element_type=jnp.float32)   # (C, N)
        mean = jnp.mean(gm, axis=1, keepdims=True)                    # (C, 1)
        meansq = jnp.mean(gm2, axis=1, keepdims=True)                 # (C, 1)
        var = meansq - mean * mean                                    # population var
        return (v - mean) * jax.lax.rsqrt(var + eps) * gamma + beta

    xn = group_norm(x)
    yn = group_norm(y)

    # 1x1 convs == channel matmuls (MXU).
    q1 = jnp.dot(wq1_ref[...], xn, preferred_element_type=jnp.float32)   # (C, N)
    k1 = jnp.dot(wk1_ref[...], xn, preferred_element_type=jnp.float32)   # (C, N)
    v2 = jnp.dot(wv2_ref[...], yn, preferred_element_type=jnp.float32)   # (C, N)

    # softmax over the spatial (lane) axis, row-wise.
    k1 = k1 - jnp.max(k1, axis=-1, keepdims=True)
    k1 = jnp.exp(k1)
    k1 = k1 / jnp.sum(k1, axis=-1, keepdims=True)

    # Per-head linear attention: cheap sublane split, batched MXU einsums.
    q1h = q1.reshape(H, D, N)
    k1h = k1.reshape(H, D, N)
    v2h = v2.reshape(H, D, N)

    # attT[h, e, d] = sum_n V2[h, e, n] * K1[h, d, n]   (== att[h, d, e])
    attT = jnp.einsum('hen,hdn->hed', v2h, k1h,
                      preferred_element_type=jnp.float32)                 # (H, D, D)
    # out[h, e, n] = sum_d att[h, d, e] * Q1[h, d, n]
    outh = jnp.einsum('hed,hdn->hen', attT, q1h,
                      preferred_element_type=jnp.float32)                 # (H, D, N)
    out = outh.reshape(C, N)

    proj = jnp.dot(wproj_ref[...], out,
                   preferred_element_type=jnp.float32) + bproj_ref[...]   # (C, N)

    out_ref[0] = x + jnp.float32(att_scale) * proj


def cross_att_spe(x, y, params, *, num_heads, norm_groups, att_num, eps=1e-5):
    """Pallas implementation of Cross_Att.forward(x, y, mode='spe')."""
    B, C, Hs, Ws = x.shape
    N = Hs * Ws
    Cg = C // norm_groups
    assert C % norm_groups == 0 and C % num_heads == 0

    f32 = jnp.float32
    x3 = x.reshape(B, C, N).astype(f32)
    y3 = y.reshape(B, C, N).astype(f32)

    # Hoisted constants / weight slices (qkv output channel order: qkv, heads, c).
    wqkv1 = params['w_qkv1'].reshape(3 * C, C).astype(f32)
    wqkv2 = params['w_qkv2'].reshape(3 * C, C).astype(f32)
    wq1 = wqkv1[0:C]
    wk1 = wqkv1[C:2 * C]
    wv2 = wqkv2[2 * C:3 * C]
    wproj = params['w_proj'].reshape(C, C).astype(f32)
    bproj = params['b_proj'].reshape(C, 1).astype(f32)
    gamma = params['gn_gamma'].reshape(C, 1).astype(f32)
    beta = params['gn_beta'].reshape(C, 1).astype(f32)

    # Group-averaging matrix: P[i, j] = 1/Cg if channels i, j share a group.
    gidx = jnp.arange(C) // Cg
    P = (gidx[:, None] == gidx[None, :]).astype(f32) / jnp.float32(Cg)

    kernel = functools.partial(
        _cross_att_spe_kernel,
        num_heads=num_heads, att_scale=float(att_num), eps=float(eps))

    const2d = lambda b: (0, 0)
    batch3d = lambda b: (b, 0, 0)

    out = pl.pallas_call(
        kernel,
        out_shape=jax.ShapeDtypeStruct((B, C, N), f32),
        grid_spec=pltpu.PrefetchScalarGridSpec(
            num_scalar_prefetch=0,
            grid=(B,),
            in_specs=[
                pl.BlockSpec((1, C, N), batch3d),   # x
                pl.BlockSpec((1, C, N), batch3d),   # y
                pl.BlockSpec((C, C), const2d),      # P
                pl.BlockSpec((C, 1), const2d),      # gamma
                pl.BlockSpec((C, 1), const2d),      # beta
                pl.BlockSpec((C, C), const2d),      # Wq1
                pl.BlockSpec((C, C), const2d),      # Wk1
                pl.BlockSpec((C, C), const2d),      # Wv2
                pl.BlockSpec((C, C), const2d),      # Wproj
                pl.BlockSpec((C, 1), const2d),      # bproj
            ],
            out_specs=pl.BlockSpec((1, C, N), batch3d),
        ),
        compiler_params=pltpu.CompilerParams(
            dimension_semantics=("parallel",)),
    )(x3, y3, P, gamma, beta, wq1, wk1, wv2, wproj, bproj)

    return out.reshape(B, C, Hs, Ws)


def _reference_spe(x, y, params, *, num_heads, norm_groups, att_num, eps=1e-5):
    """Pure-JAX reference mirroring the PyTorch forward (mode='spe')."""
    B, C, Hs, Ws = x.shape
    N = Hs * Ws
    Cg = C // norm_groups
    D = C // num_heads

    def gn(v):
        vg = v.reshape(B, norm_groups, Cg, Hs, Ws)
        mean = jnp.mean(vg, axis=(2, 3, 4), keepdims=True)
        var = jnp.mean(jnp.square(vg - mean), axis=(2, 3, 4), keepdims=True)
        vn = ((vg - mean) * jax.lax.rsqrt(var + eps)).reshape(B, C, Hs, Ws)
        return (vn * params['gn_gamma'].reshape(1, C, 1, 1)
                + params['gn_beta'].reshape(1, C, 1, 1))

    xn = gn(x)
    yn = gn(y)

    def conv1x1(v, w):
        return jnp.einsum('oc,bchw->bohw', w, v)

    wqkv1 = params['w_qkv1'].reshape(3 * C, C)
    wqkv2 = params['w_qkv2'].reshape(3 * C, C)
    qkv1 = conv1x1(xn, wqkv1).reshape(B, 3, num_heads, D, N)
    qkv2 = conv1x1(yn, wqkv2).reshape(B, 3, num_heads, D, N)
    q1, k1 = qkv1[:, 0], qkv1[:, 1]
    v2 = qkv2[:, 2]

    k1 = jax.nn.softmax(k1, axis=-1)
    att = jnp.einsum('bhdn,bhen->bhde', k1, v2)
    out = jnp.einsum('bhde,bhdn->bhen', att, q1).reshape(B, C, Hs, Ws)

    proj = (conv1x1(out, params['w_proj'].reshape(C, C))
            + params['b_proj'].reshape(1, C, 1, 1))
    return x + att_num * proj


if __name__ == "__main__":
    key = jax.random.PRNGKey(0)
    B, C, Hs, Ws = 2, 64, 16, 16          # N = 256 (lane-dense)
    num_heads, norm_groups = 4, 32
    att_num = 1.0                          # nonzero so the attention path is exercised

    keys = jax.random.split(key, 8)
    x = jax.random.normal(keys[0], (B, C, Hs, Ws), jnp.float32)
    y = jax.random.normal(keys[1], (B, C, Hs, Ws), jnp.float32)
    scale = 1.0 / math.sqrt(C)
    params = dict(
        gn_gamma=1.0 + 0.1 * jax.random.normal(keys[2], (C,), jnp.float32),
        gn_beta=0.1 * jax.random.normal(keys[3], (C,), jnp.float32),
        w_qkv1=scale * jax.random.normal(keys[4], (3 * C, C), jnp.float32),
        w_qkv2=scale * jax.random.normal(keys[5], (3 * C, C), jnp.float32),
        w_proj=scale * jax.random.normal(keys[6], (C, C), jnp.float32),
        b_proj=0.1 * jax.random.normal(keys[7], (C,), jnp.float32),
    )

    out = cross_att_spe(x, y, params, num_heads=num_heads,
                        norm_groups=norm_groups, att_num=att_num)
    out = jax.block_until_ready(out)

    ref = _reference_spe(x, y, params, num_heads=num_heads,
                         norm_groups=norm_groups, att_num=att_num)

    assert out.shape == (B, C, Hs, Ws)
    assert jnp.allclose(out, ref, atol=1e-3, rtol=1e-3), "mismatch vs reference"
    print("KERNEL_OK")
</pallas_src>

<mosaic_0001>
module attributes {stable_mosaic.version = 11 : i64} {
  func.func @_cross_att_spe_kernel(%arg0: i32, %arg1: memref<1x64x256xf32, #tpu.memory_space<vmem>>, %arg2: memref<1x64x256xf32, #tpu.memory_space<vmem>>, %arg3: memref<64x64xf32, #tpu.memory_space<vmem>>, %arg4: memref<64x1xf32, #tpu.memory_space<vmem>>, %arg5: memref<64x1xf32, #tpu.memory_space<vmem>>, %arg6: memref<64x64xf32, #tpu.memory_space<vmem>>, %arg7: memref<64x64xf32, #tpu.memory_space<vmem>>, %arg8: memref<64x64xf32, #tpu.memory_space<vmem>>, %arg9: memref<64x64xf32, #tpu.memory_space<vmem>>, %arg10: memref<64x1xf32, #tpu.memory_space<vmem>>, %arg11: memref<1x64x256xf32, #tpu.memory_space<vmem>>) attributes {dimension_semantics = [#tpu.dimension_semantics<parallel>], iteration_bounds = array<i64: 2>, scalar_prefetch = 0 : i64, scratch_operands = 0 : i64, tpu.core_type = #tpu.core_type<tc>, window_params = [{transform_indices = @transform_0, window_bounds = array<i64: 1, 64, 256>}, {transform_indices = @transform_1, window_bounds = array<i64: 1, 64, 256>}, {pipeline_mode = #tpu.pipeline_mode<synchronous>, transform_indices = @transform_2, window_bounds = array<i64: 64, 64>}, {pipeline_mode = #tpu.pipeline_mode<synchronous>, transform_indices = @transform_3, window_bounds = array<i64: 64, 1>}, {pipeline_mode = #tpu.pipeline_mode<synchronous>, transform_indices = @transform_4, window_bounds = array<i64: 64, 1>}, {pipeline_mode = #tpu.pipeline_mode<synchronous>, transform_indices = @transform_5, window_bounds = array<i64: 64, 64>}, {pipeline_mode = #tpu.pipeline_mode<synchronous>, transform_indices = @transform_6, window_bounds = array<i64: 64, 64>}, {pipeline_mode = #tpu.pipeline_mode<synchronous>, transform_indices = @transform_7, window_bounds = array<i64: 64, 64>}, {pipeline_mode = #tpu.pipeline_mode<synchronous>, transform_indices = @transform_8, window_bounds = array<i64: 64, 64>}, {pipeline_mode = #tpu.pipeline_mode<synchronous>, transform_indices = @transform_9, window_bounds = array<i64: 64, 1>}, {transform_indices = @transform_10, window_bounds = array<i64: 1, 64, 256>}]} {
    %c0 = arith.constant 0 : index
    %c0_0 = arith.constant 0 : index
    %c0_1 = arith.constant 0 : index
    %0 = vector.load %arg1[%c0, %c0_0, %c0_1] : memref<1x64x256xf32, #tpu.memory_space<vmem>>, vector<1x64x256xf32>
    %1 = vector.shape_cast %0 : vector<1x64x256xf32> to vector<64x256xf32>
    %c0_2 = arith.constant 0 : index
    %c0_3 = arith.constant 0 : index
    %c0_4 = arith.constant 0 : index
    %2 = vector.load %arg2[%c0_2, %c0_3, %c0_4] : memref<1x64x256xf32, #tpu.memory_space<vmem>>, vector<1x64x256xf32>
    %3 = vector.shape_cast %2 : vector<1x64x256xf32> to vector<64x256xf32>
    %c0_5 = arith.constant 0 : index
    %c0_6 = arith.constant 0 : index
    %4 = vector.load %arg3[%c0_5, %c0_6] : memref<64x64xf32, #tpu.memory_space<vmem>>, vector<64x64xf32>
    %c0_7 = arith.constant 0 : index
    %c0_8 = arith.constant 0 : index
    %5 = vector.load %arg4[%c0_7, %c0_8] : memref<64x1xf32, #tpu.memory_space<vmem>>, vector<64x1xf32>
    %c0_9 = arith.constant 0 : index
    %c0_10 = arith.constant 0 : index
    %6 = vector.load %arg5[%c0_9, %c0_10] : memref<64x1xf32, #tpu.memory_space<vmem>>, vector<64x1xf32>
    %cst = arith.constant dense<0.000000e+00> : vector<64x256xf32>
    %7 = tpu.matmul %4, %1, %cst {dimension_numbers = #tpu.dot_dimension_numbers<[1], [0], [0], [1], [0, 0, 1, 1], [], []>} : vector<64x64xf32>, vector<64x256xf32>, vector<64x256xf32> -> vector<64x256xf32>
    %8 = arith.mulf %1, %1 : vector<64x256xf32>
    %cst_11 = arith.constant dense<0.000000e+00> : vector<64x256xf32>
    %9 = tpu.matmul %4, %8, %cst_11 {dimension_numbers = #tpu.dot_dimension_numbers<[1], [0], [0], [1], [0, 0, 1, 1], [], []>} : vector<64x64xf32>, vector<64x256xf32>, vector<64x256xf32> -> vector<64x256xf32>
    %cst_12 = arith.constant dense<0.000000e+00> : vector<64xf32>
    %10 = vector.multi_reduction <add>, %7, %cst_12 [1] : vector<64x256xf32> to vector<64xf32>
    %11 = vector.shape_cast %10 : vector<64xf32> to vector<64x1xf32>
    %cst_13 = arith.constant 2.560000e+02 : f32
    %12 = vector.broadcast %cst_13 : f32 to vector<64x1xf32>
    %13 = arith.divf %11, %12 : vector<64x1xf32>
    %cst_14 = arith.constant dense<0.000000e+00> : vector<64xf32>
    %14 = vector.multi_reduction <add>, %9, %cst_14 [1] : vector<64x256xf32> to vector<64xf32>
    %15 = vector.shape_cast %14 : vector<64xf32> to vector<64x1xf32>
    %cst_15 = arith.constant 2.560000e+02 : f32
    %16 = vector.broadcast %cst_15 : f32 to vector<64x1xf32>
    %17 = arith.divf %15, %16 : vector<64x1xf32>
    %18 = arith.mulf %13, %13 : vector<64x1xf32>
    %19 = arith.subf %17, %18 : vector<64x1xf32>
    %20 = vector.broadcast %13 : vector<64x1xf32> to vector<64x256xf32>
    %21 = arith.subf %1, %20 : vector<64x256xf32>
    %cst_16 = arith.constant 9.99999974E-6 : f32
    %22 = vector.broadcast %cst_16 : f32 to vector<64x1xf32>
    %23 = arith.addf %19, %22 : vector<64x1xf32>
    %24 = math.rsqrt %23 : vector<64x1xf32>
    %25 = vector.broadcast %24 : vector<64x1xf32> to vector<64x256xf32>
    %26 = arith.mulf %21, %25 : vector<64x256xf32>
    %27 = vector.broadcast %5 : vector<64x1xf32> to vector<64x256xf32>
    %28 = arith.mulf %26, %27 : vector<64x256xf32>
    %29 = vector.broadcast %6 : vector<64x1xf32> to vector<64x256xf32>
    %30 = arith.addf %28, %29 : vector<64x256xf32>
    %cst_17 = arith.constant dense<0.000000e+00> : vector<64x256xf32>
    %31 = tpu.matmul %4, %3, %cst_17 {dimension_numbers = #tpu.dot_dimension_numbers<[1], [0], [0], [1], [0, 0, 1, 1], [], []>} : vector<64x64xf32>, vector<64x256xf32>, vector<64x256xf32> -> vector<64x256xf32>
    %32 = arith.mulf %3, %3 : vector<64x256xf32>
    %cst_18 = arith.constant dense<0.000000e+00> : vector<64x256xf32>
    %33 = tpu.matmul %4, %32, %cst_18 {dimension_numbers = #tpu.dot_dimension_numbers<[1], [0], [0], [1], [0, 0, 1, 1], [], []>} : vector<64x64xf32>, vector<64x256xf32>, vector<64x256xf32> -> vector<64x256xf32>
    %cst_19 = arith.constant dense<0.000000e+00> : vector<64xf32>
    %34 = vector.multi_reduction <add>, %31, %cst_19 [1] : vector<64x256xf32> to vector<64xf32>
    %35 = vector.shape_cast %34 : vector<64xf32> to vector<64x1xf32>
    %cst_20 = arith.constant 2.560000e+02 : f32
    %36 = vector.broadcast %cst_20 : f32 to vector<64x1xf32>
    %37 = arith.divf %35, %36 : vector<64x1xf32>
    %cst_21 = arith.constant dense<0.000000e+00> : vector<64xf32>
    %38 = vector.multi_reduction <add>, %33, %cst_21 [1] : vector<64x256xf32> to vector<64xf32>
    %39 = vector.shape_cast %38 : vector<64xf32> to vector<64x1xf32>
    %cst_22 = arith.constant 2.560000e+02 : f32
    %40 = vector.broadcast %cst_22 : f32 to vector<64x1xf32>
    %41 = arith.divf %39, %40 : vector<64x1xf32>
    %42 = arith.mulf %37, %37 : vector<64x1xf32>
    %43 = arith.subf %41, %42 : vector<64x1xf32>
    %44 = vector.broadcast %37 : vector<64x1xf32> to vector<64x256xf32>
    %45 = arith.subf %3, %44 : vector<64x256xf32>
    %cst_23 = arith.constant 9.99999974E-6 : f32
    %46 = vector.broadcast %cst_23 : f32 to vector<64x1xf32>
    %47 = arith.addf %43, %46 : vector<64x1xf32>
    %48 = math.rsqrt %47 : vector<64x1xf32>
    %49 = vector.broadcast %48 : vector<64x1xf32> to vector<64x256xf32>
    %50 = arith.mulf %45, %49 : vector<64x256xf32>
    %51 = vector.broadcast %5 : vector<64x1xf32> to vector<64x256xf32>
    %52 = arith.mulf %50, %51 : vector<64x256xf32>
    %53 = vector.broadcast %6 : vector<64x1xf32> to vector<64x256xf32>
    %54 = arith.addf %52, %53 : vector<64x256xf32>
    %c0_24 = arith.constant 0 : index
    %c0_25 = arith.constant 0 : index
    %55 = vector.load %arg6[%c0_24, %c0_25] : memref<64x64xf32, #tpu.memory_space<vmem>>, vector<64x64xf32>
    %cst_26 = arith.constant dense<0.000000e+00> : vector<64x256xf32>
    %56 = tpu.matmul %55, %30, %cst_26 {dimension_numbers = #tpu.dot_dimension_numbers<[1], [0], [0], [1], [0, 0, 1, 1], [], []>} : vector<64x64xf32>, vector<64x256xf32>, vector<64x256xf32> -> vector<64x256xf32>
    %c0_27 = arith.constant 0 : index
    %c0_28 = arith.constant 0 : index
    %57 = vector.load %arg7[%c0_27, %c0_28] : memref<64x64xf32, #tpu.memory_space<vmem>>, vector<64x64xf32>
    %cst_29 = arith.constant dense<0.000000e+00> : vector<64x256xf32>
    %58 = tpu.matmul %57, %30, %cst_29 {dimension_numbers = #tpu.dot_dimension_numbers<[1], [0], [0], [1], [0, 0, 1, 1], [], []>} : vector<64x64xf32>, vector<64x256xf32>, vector<64x256xf32> -> vector<64x256xf32>
    %c0_30 = arith.constant 0 : index
    %c0_31 = arith.constant 0 : index
    %59 = vector.load %arg8[%c0_30, %c0_31] : memref<64x64xf32, #tpu.memory_space<vmem>>, vector<64x64xf32>
    %cst_32 = arith.constant dense<0.000000e+00> : vector<64x256xf32>
    %60 = tpu.matmul %59, %54, %cst_32 {dimension_numbers = #tpu.dot_dimension_numbers<[1], [0], [0], [1], [0, 0, 1, 1], [], []>} : vector<64x64xf32>, vector<64x256xf32>, vector<64x256xf32> -> vector<64x256xf32>
    %cst_33 = arith.constant dense<0xFF800000> : vector<64xf32>
    %61 = vector.multi_reduction <maximumf>, %58, %cst_33 [1] : vector<64x256xf32> to vector<64xf32>
    %62 = vector.shape_cast %61 : vector<64xf32> to vector<64x1xf32>
    %63 = vector.broadcast %62 : vector<64x1xf32> to vector<64x256xf32>
    %64 = arith.subf %58, %63 : vector<64x256xf32>
    %65 = math.exp %64 : vector<64x256xf32>
    %cst_34 = arith.constant dense<0.000000e+00> : vector<64xf32>
    %66 = vector.multi_reduction <add>, %65, %cst_34 [1] : vector<64x256xf32> to vector<64xf32>
    %67 = vector.shape_cast %66 : vector<64xf32> to vector<64x1xf32>
    %68 = vector.broadcast %67 : vector<64x1xf32> to vector<64x256xf32>
    %69 = arith.divf %65, %68 : vector<64x256xf32>
    %70 = vector.shape_cast %56 : vector<64x256xf32> to vector<4x16x256xf32>
    %71 = vector.shape_cast %69 : vector<64x256xf32> to vector<4x16x256xf32>
    %72 = vector.shape_cast %60 : vector<64x256xf32> to vector<4x16x256xf32>
    "tpu.trace_start"() <{level = 10 : i32, message = "hen,hdn->hed"}> : () -> ()
    %cst_35 = arith.constant dense<0.000000e+00> : vector<4x16x16xf32>
    %73 = tpu.matmul %72, %71, %cst_35 {dimension_numbers = #tpu.dot_dimension_numbers<[2], [2], [1], [1], [0, 0, 0, 1, 1, 1], [0], [0]>} : vector<4x16x256xf32>, vector<4x16x256xf32>, vector<4x16x16xf32> -> vector<4x16x16xf32>
    "tpu.trace_stop"() : () -> ()
    "tpu.trace_start"() <{level = 10 : i32, message = "hed,hdn->hen"}> : () -> ()
    %cst_36 = arith.constant dense<0.000000e+00> : vector<4x16x256xf32>
    %74 = tpu.matmul %73, %70, %cst_36 {dimension_numbers = #tpu.dot_dimension_numbers<[2], [1], [1], [2], [0, 0, 0, 1, 1, 2], [0], [0]>} : vector<4x16x16xf32>, vector<4x16x256xf32>, vector<4x16x256xf32> -> vector<4x16x256xf32>
    "tpu.trace_stop"() : () -> ()
    %75 = vector.shape_cast %74 : vector<4x16x256xf32> to vector<64x256xf32>
    %c0_37 = arith.constant 0 : index
    %c0_38 = arith.constant 0 : index
    %76 = vector.load %arg9[%c0_37, %c0_38] : memref<64x64xf32, #tpu.memory_space<vmem>>, vector<64x64xf32>
    %cst_39 = arith.constant dense<0.000000e+00> : vector<64x256xf32>
    %77 = tpu.matmul %76, %75, %cst_39 {dimension_numbers = #tpu.dot_dimension_numbers<[1], [0], [0], [1], [0, 0, 1, 1], [], []>} : vector<64x64xf32>, vector<64x256xf32>, vector<64x256xf32> -> vector<64x256xf32>
    %c0_40 = arith.constant 0 : index
    %c0_41 = arith.constant 0 : index
    %78 = vector.load %arg10[%c0_40, %c0_41] : memref<64x1xf32, #tpu.memory_space<vmem>>, vector<64x1xf32>
    %79 = vector.broadcast %78 : vector<64x1xf32> to vector<64x256xf32>
    %80 = arith.addf %77, %79 : vector<64x256xf32>
    %cst_42 = arith.constant 1.000000e+00 : f32
    %81 = vector.broadcast %cst_42 : f32 to vector<64x256xf32>
    %82 = arith.mulf %81, %80 : vector<64x256xf32>
    %83 = arith.addf %1, %82 : vector<64x256xf32>
    %c0_43 = arith.constant 0 : index
    %c0_44 = arith.constant 0 : index
    %c0_45 = arith.constant 0 : index
    %84 = vector.load %arg11[%c0_43, %c0_44, %c0_45] : memref<1x64x256xf32, #tpu.memory_space<vmem>>, vector<1x64x256xf32>
    %85 = vector.shape_cast %84 : vector<1x64x256xf32> to vector<64x256xf32>
    %86 = vector.shape_cast %83 : vector<64x256xf32> to vector<1x64x256xf32>
    tpu.vector_store %arg11[%c0_43, %c0_44, %c0_45], %86 {strides = array<i32>} : memref<1x64x256xf32, #tpu.memory_space<vmem>>, vector<1x64x256xf32>,
    return
  }
  func.func @transform_0(%arg0: i32) -> (i32, i32, i32) {
    %c0_i32 = arith.constant 0 : i32
    %c0_i32_0 = arith.constant 0 : i32
    %c0_i32_1 = arith.constant 0 : i32
    return %arg0, %c0_i32, %c0_i32_0 : i32, i32, i32
  }
  func.func @transform_1(%arg0: i32) -> (i32, i32, i32) {
    %c0_i32 = arith.constant 0 : i32
    %c0_i32_0 = arith.constant 0 : i32
    %c0_i32_1 = arith.constant 0 : i32
    return %arg0, %c0_i32, %c0_i32_0 : i32, i32, i32
  }
  func.func @transform_2(%arg0: i32) -> (i32, i32) {
    %c0_i32 = arith.constant 0 : i32
    %c0_i32_0 = arith.constant 0 : i32
    %c0_i32_1 = arith.constant 0 : i32
    return %c0_i32, %c0_i32_0 : i32, i32
  }
  func.func @transform_3(%arg0: i32) -> (i32, i32) {
    %c0_i32 = arith.constant 0 : i32
    %c0_i32_0 = arith.constant 0 : i32
    %c0_i32_1 = arith.constant 0 : i32
    return %c0_i32, %c0_i32_0 : i32, i32
  }
  func.func @transform_4(%arg0: i32) -> (i32, i32) {
    %c0_i32 = arith.constant 0 : i32
    %c0_i32_0 = arith.constant 0 : i32
    %c0_i32_1 = arith.constant 0 : i32
    return %c0_i32, %c0_i32_0 : i32, i32
  }
  func.func @transform_5(%arg0: i32) -> (i32, i32) {
    %c0_i32 = arith.constant 0 : i32
    %c0_i32_0 = arith.constant 0 : i32
    %c0_i32_1 = arith.constant 0 : i32
    return %c0_i32, %c0_i32_0 : i32, i32
  }
  func.func @transform_6(%arg0: i32) -> (i32, i32) {
    %c0_i32 = arith.constant 0 : i32
    %c0_i32_0 = arith.constant 0 : i32
    %c0_i32_1 = arith.constant 0 : i32
    return %c0_i32, %c0_i32_0 : i32, i32
  }
  func.func @transform_7(%arg0: i32) -> (i32, i32) {
    %c0_i32 = arith.constant 0 : i32
    %c0_i32_0 = arith.constant 0 : i32
    %c0_i32_1 = arith.constant 0 : i32
    return %c0_i32, %c0_i32_0 : i32, i32
  }
  func.func @transform_8(%arg0: i32) -> (i32, i32) {
    %c0_i32 = arith.constant 0 : i32
    %c0_i32_0 = arith.constant 0 : i32
    %c0_i32_1 = arith.constant 0 : i32
    return %c0_i32, %c0_i32_0 : i32, i32
  }
  func.func @transform_9(%arg0: i32) -> (i32, i32) {
    %c0_i32 = arith.constant 0 : i32
    %c0_i32_0 = arith.constant 0 : i32
    %c0_i32_1 = arith.constant 0 : i32
    return %c0_i32, %c0_i32_0 : i32, i32
  }
  func.func @transform_10(%arg0: i32) -> (i32, i32, i32) {
    %c0_i32 = arith.constant 0 : i32
    %c0_i32_0 = arith.constant 0 : i32
    %c0_i32_1 = arith.constant 0 : i32
    return %arg0, %c0_i32, %c0_i32_0 : i32, i32, i32
  }
}

</mosaic_0001>

<bundles_post_ra>
// kernel: tpu_custom_call.1
= control target key start
LH: loop header
LB: loop body
LE: loop exit
PB: predicated region body
PF: predicated region fallthrough
CT: control target
= control target key end

     0   :  { %s4794_s0 = inlined_call_operand.hbm [shape: f32[2,64,256], index: 0, kind: input, shape index: {}]   ;;  %s4795_s1 = inlined_call_operand.hbm [shape: f32[2,64,256], index: 1, kind: input, shape index: {}]   ;;  %s4796_s2 = inlined_call_operand.vmem [shape: f32[64,64], index: 2, kind: input, shape index: {}]   ;;  %s4797_s3 = inlined_call_operand.vmem [shape: f32[64,1], index: 3, kind: input, shape index: {}]   ;;  %s4798_s4 = inlined_call_operand.vmem [shape: f32[64,1], index: 4, kind: input, shape index: {}]   ;;  %s4799_s5 = inlined_call_operand.vmem [shape: f32[64,64], index: 5, kind: input, shape index: {}]   ;;  %s4800_s6 = inlined_call_operand.vmem [shape: f32[64,64], index: 6, kind: input, shape index: {}]   ;;  %s4801_s7 = inlined_call_operand.hbm [shape: f32[64,64], index: 7, kind: input, shape index: {}]   ;;  %s4802_s8 = inlined_call_operand.hbm [shape: f32[64,64], index: 8, kind: input, shape index: {}]   ;;  %s4803_s9 = inlined_call_operand.vmem [shape: f32[64,1], index: 9, kind: input, shape index: {}]   ;;  %s4804_s10 = inlined_call_operand.hbm [shape: f32[2,64,256], index: 10, kind: output, shape index: {}]  }
   0x1   :  { %4822 = sst [smem:[#allocation29_spill]] %s4794_s0 }
   0x2   :  { %4823 = sst [smem:[#allocation30_spill]] %s4801_s7 }
   0x3   :  { %4824 = sst [smem:[#allocation31_spill]] %s4802_s8 }
   0x4   :  { %15 = vsyncpa [#allocation3], 0 }
   0x5   :  { %17 = vsyncpa [#allocation3 + $0x1], 0 }
   0x6   :  { %18 = vsyncpa [#allocation6], 0 }
   0x7   :  { %20 = vsyncpa [#allocation6 + $0x1], 0 }
   0x8   :  { %21 = vsyncpa [#allocation9], 0 }
   0x9   :  { %22 = vsyncpa [#allocation4], 0 }
   0xa   :  { %24 = vsyncpa [#allocation4 + $0x1], 0  ;;  %s3379_s13 = smov 0   ;;  %s3381_s14 = smov 0  }
   0xb   :  { %s3383_s15 = smov 0   ;;  %s3385_s16 = smov 0  }
   0xc LB: > { %4825 = sst [smem:[#allocation16_spill]] %s3300_s13  ;;  %s3400_s17 = sadd.s32 4294967295, %s3312_s16   ;;  %s3312_s16 = sphi %s3385_s16, %s4877_s16   ;;  %s3308_s15 = sphi %s3383_s15, %s4879_s15   ;;  %s3304_s14 = sphi %s3381_s14, %s4881_s14   ;;  %s3300_s13 = sphi %s3379_s13, %s4880_s13  }
   0xd   : > { %4826 = sst [smem:[#allocation17_spill]] %s3308_s15  ;;  %s2731_s18 = sadd.s32 4294967294, %s3312_s16  }
   0xe   : > { %p50_p0 = scmp.ne.s32.totalorder %s3304_s14, %s3300_s13  ;;  %p51_p1 = scmp.eq.s32.totalorder %s3400_s17, 0 }
   0xf   : > { %p268_p2 = scmp.eq.s32.totalorder %s3400_s17, 1  ;;  %p274_p3 = scmp.eq.s32.totalorder %s2731_s18, 1 }
  0x10   : > { %p3409_p4 = por %p51_p1, %p50_p0  ;;  %p2732_p5 = scmp.ge.s32.totalorder %s3312_s16, 1 }
  0x11   : > { %p3414_p6 = por %p274_p3, %p50_p0  ;;  %p281_p7 = scmp.lt.s32.totalorder %s3312_s16, 3 }
  0x12   : > { %s4830_s7 = sld [smem:[#allocation30_spill]]  ;;  %s3314_s25 = smov [#allocation7]  }
  0x13   : > { %s4828_s20 = scalar_select %p3414_p6, 1, 0 }
  0x14   : > { %p3422_p8 = pnand %p2732_p5, %p281_p7  ;;  %s309_s26 = sshll.u32 %s3314_s25, 4  ;;  %s310_s26 = int_to_ptr.vmem [resolvable:$true] %s309_s26 }
  0x15   : > { %4829 = sst [smem:[#allocation18_spill]] %s4828_s20  ;;  %s3315_s30 = smov 128  }
  0x16   : > { %p2930_p9 = pneg %p3422_p8  ;;  %s4832_s8 = sld [smem:[#allocation31_spill]] }
  0x17   : > { %s3316_s11 = smov 8   ;;  %s3317_s12 = smov [#allocation8]  }
  0x18   : > { %s307_s23 = sshll.u32 %s4830_s7, 4  ;;  %p2931_p10 = pnand %p2930_p9, %p51_p1  ;;  %s308_s23 = int_to_ptr.hbm [resolvable:$true] %s307_s23 }
  0x19   : > { %s323_s18 = sshll.u32 %s3317_s12, 4  ;;  %s3435_s21 = sadd.s32 1, %s3312_s16   ;;  %s324_s18 = int_to_ptr.vmem [resolvable:$true] %s323_s18 }
  0x1a   : > { %2933 = dma.hbm_to_vmem [thread:$0]  (!%p2931_p10), %s308_s23, 1024, %s310_s26, [#allocation6], %s3315_s30, %s3315_s30, %s3316_s11  }
  0x1b   : > { %4833 = sst [smem:[#allocation19_spill]] %s3435_s21  ;;  %s37_s22 = sadd.s32 1, %s3308_s15 }
  0x1c   : > { %s321_s29 = sshll.u32 %s4832_s8, 4  ;;  %s34_s25 = ssub.s32 %s3312_s16, %s3435_s21  ;;  %s322_s29 = int_to_ptr.hbm [resolvable:$true] %s321_s29 }
  0x1d   : > { %2936 = dma.hbm_to_vmem [thread:$0]  (!%p2931_p10), %s322_s29, 1024, %s324_s18, [#allocation9], %s3315_s30, %s3315_s30, %s3316_s11  }
  0x1e   : > { %p44_p12 = scmp.ne.s32.totalorder %s3308_s15, %s3304_s14  ;;  %p35_p13 = scmp.eq.s32.totalorder %s34_s25, 0 }
  0x1f   : > { %p45_p0 = scmp.eq.s32.totalorder %s3312_s16, 0  ;;  %p2950_p5 = scmp.lt.s32.totalorder %s3312_s16, 2 }
  0x20   : > { %p3445_p3 = por %p268_p2, %p44_p12  ;;  %s340_s26 = sand.u32 1, %s3308_s15  }
  0x21   : > { %s3451_s23 = scalar_select %p35_p13, %s3308_s15, %s37_s22  }
  0x22   : > { %s4834_s27 = scalar_select %p3445_p3, 1, 0 }
  0x23   : > { %4836 = sst [smem:[#allocation21_spill]] %s3451_s23  ;;  %p46_p7 = por %p45_p0, %p44_p12 }
  0x24   : > { %4835 = sst [smem:[#allocation20_spill]] %s4834_s27  ;;  %s3454_s28 = sshll.u32 %s340_s26, 7 }
  0x25   : > { %s4806_s29 = sshll.u32 %s3312_s16, 7  ;;  %s4837_s0 = sld [smem:[#allocation29_spill]] }
  0x26   : > { %s344_s18 = scalar_lea.vmem [#allocation2], %s3454_s28  ;;  %p3463_p2 = pnand %p2950_p5, %p46_p7 }
  0x27   : > { %s352_s25 = sshll.u32 %s344_s18, 4  ;;  %s341_s22 = scalar_lea.sflag [#allocation3], %s340_s26  ;;  %s353_s25 = int_to_ptr.vmem [resolvable:$true] %s352_s25 }
  0x28   : > { %p3178_p10 = pneg %p3463_p2 }
  0x2b   : > { %s349_s12 = scalar_lea.hbm %s4837_s0, %s4806_s29 }
  0x2c   : > { %s350_s7 = sshll.u32 %s349_s12, 4  ;;  %s3181_s12 = scalar_lea.hbm %s4837_s0, 256  ;;  %s351_s7 = int_to_ptr.hbm [resolvable:$true] %s350_s7 }
  0x2d   : > { %s3174_s23 = sshra.s32 %s351_s7, 4  ;;  %s3175_s23 = int_to_ptr.hbm [resolvable:$true] %s3174_s23 }
  0x2e   : > { %s3176_s15 = scalar_lea.hbm %s3175_s23, 128  ;;  %p3182_p0 = scmp.lt.s32.totalorder %s3175_s23, %s4837_s0 }
  0x2f   : > { %p3177_p9 = scmp.ne.s32.totalorder %s3175_s23, %s3176_s15  ;;  %p3183_p5 = scmp.lt.s32.totalorder %s3181_s12, %s3176_s15 }
  0x31   : > { %p3179_p12 = pnand %p3178_p10, %p3177_p9  ;;  %p3184_p7 = por %p3183_p5, %p3182_p0 }
  0x33   : > { %p3180_p13 = pneg %p3179_p12 }
  0x35   : > { %p3185_p11 = pnand %p3184_p7, %p3180_p13 }
  0x37   : > { %3188 = shalt.err (!%p3185_p11)
}
  0x38   : > { %s3318_s26 = smov 256   ;;  %s3319_s21 = smov 16  }
  0x39   : > { %2940 = dma.hbm_to_vmem [thread:$0]  (!%p3463_p2), %s351_s7, 2048, %s353_s25, %s341_s22, %s3318_s26, %s3318_s26, %s3319_s21  }
  0x3a   : > { %s4839_s20 = sshll.u32 %s3312_s16, 7  ;;  %s366_s29 = scalar_lea.vmem [#allocation5], %s3454_s28 }
  0x3b   : > { %s371_s13 = scalar_lea.hbm %s4795_s1, %s4839_s20  ;;  %s374_s23 = sshll.u32 %s366_s29, 4  ;;  %s375_s23 = int_to_ptr.vmem [resolvable:$true] %s374_s23 }
  0x3c   : > { %s372_s15 = sshll.u32 %s371_s13, 4  ;;  %s362_s12 = sand.u32 1, %s3312_s16   ;;  %s373_s15 = int_to_ptr.hbm [resolvable:$true] %s372_s15 }
  0x3d   : > { %s363_s18 = scalar_lea.sflag [#allocation6], %s362_s12  ;;  %s3204_s0 = sshra.s32 %s373_s15, 4  ;;  %s3205_s0 = int_to_ptr.hbm [resolvable:$true] %s3204_s0 }
  0x3e   : > { %s3206_s27 = scalar_lea.hbm %s3205_s0, 128  ;;  %s3211_s22 = scalar_lea.hbm %s4795_s1, 256 }
  0x3f   : > { %p3207_p11 = scmp.ne.s32.totalorder %s3205_s0, %s3206_s27  ;;  %p3212_p13 = scmp.lt.s32.totalorder %s3205_s0, %s4795_s1 }
  0x40   : > { %p3213_p0 = scmp.lt.s32.totalorder %s3211_s22, %s3206_s27 }
  0x41   : > { %p3209_p9 = pnand %p3207_p11, %p3178_p10 }
  0x42   : > { %p3214_p5 = por %p3213_p0, %p3212_p13 }
  0x43   : > { %p3210_p12 = pneg %p3209_p9 }
  0x45   : > { %p3215_p7 = pnand %p3214_p5, %p3210_p12 }
  0x47   : > { %3218 = shalt.err (!%p3215_p7)
}
  0x48   : > { %2943 = dma.hbm_to_vmem [thread:$0]  (!%p3463_p2), %s373_s15, 2048, %s375_s23, %s363_s18, %s3318_s26, %s3318_s26, %s3319_s21  }
  0x49   : > { %386 = sbr.rel (%p3422_p8) target bundleno = 1433 (0x599), region = 60 }
  0x4e   : > { %s3501_s13 = sand.u32 1, %s3304_s14  }
  0x4f   : > { %s3504_s30 = sshll.u32 %s3501_s13, 7  ;;  %s389_s0 = scalar_lea.sflag [#allocation3], %s3501_s13 }
  0x50   : > { %s3508_s27 = scalar_lea.vmem [#allocation2], %s3504_s30 }
  0x51   : > { %3279 = dma.done.wait (%p3409_p4), %s389_s0, 2048  }
  0x52   : > { %3281 = vsyncadd (%p3409_p4), %s389_s0, 4294965248  ;;  %s398_s8 = sand.u32 1, %s3400_s17   ;;  %s3516_s21 = scalar_lea.vmem [#allocation5], %s3504_s30 }
  0x53   : > { %s399_s24 = scalar_lea.sflag [#allocation6], %s398_s8 }
  0x54   : > { %3283 = dma.done.wait (%p3409_p4), %s399_s24, 2048  }
  0x55   : > { %3285 = vsyncadd (%p3409_p4), %s399_s24, 4294965248 }
  0x56   : > { %3287 = dma.done.wait (%p51_p1), [#allocation6], 1024  }
  0x57   : > { %3289 = vsyncadd (%p51_p1), [#allocation6], 4294966272 }
  0x58   : > { %3291 = dma.done.wait (%p51_p1), [#allocation9], 1024  }
  0x59   : > { %3293 = vsyncadd (%p51_p1), [#allocation9], 4294966272  ;;  %v3531_v0 = vld [vmem:[%s3508_s27 + $0x70] sm:$0xff]  ;;  %v3534_v1 = vld [vmem:[%s3508_s27 + $0x78] sm:$0xff]  ;;  %vm511_vm0 = vcmask 523264   ;;  %v3320_v42 = vmov 0  }
  0x5a   : > { %v3537_v2 = vld [vmem:[%s3508_s27 + $0x60] sm:$0xff]  ;;  %544 = vmatpush.msra.mxu0 %v3531_v0  ;;  %2900 = vmatpush.msra.mxu2 %v3531_v0  ;;  %v3542_v3 = vld [vmem:[%s3508_s27 + $0x68] sm:$0xff]  ;;  %v3547_v4 = vld [vmem:[%s3508_s27 + $0x50] sm:$0xff]  ;;  %v632_v18 = vmul.f32 %v3531_v0, %v3531_v0  ;;  %v633_v19 = vmul.f32 %v3534_v1, %v3534_v1  ;;  %s4728_s8 = scalar_lea.vmem [#allocation10], %s3504_s30  ;;  %s2899_s30 = sshll.u32 %s3400_s17, 7 }
  0x5b   : > { %585 = vmatpush.msra.mxu1 %v3534_v1  ;;  %2908 = vmatpush.msra.mxu3 %v3534_v1  ;;  %v3552_v5 = vld [vmem:[%s3508_s27 + $0x58] sm:$0xff]  ;;  %v3557_v6 = vld [vmem:[%s3508_s27 + $0x40] sm:$0xff]  ;;  %v3562_v7 = vld [vmem:[%s3508_s27 + $0x48] sm:$0xff]  ;;  %v630_v20 = vmul.f32 %v3537_v2, %v3537_v2  ;;  %v631_v21 = vmul.f32 %v3542_v3, %v3542_v3  ;;  %v628_v22 = vmul.f32 %v3547_v4, %v3547_v4  ;;  %s2612_s19 = scalar_lea.hbm %s4804_s10, %s2899_s30  ;;  %s2613_s26 = sshll.u32 %s4728_s8, 4  ;;  %s2614_s26 = int_to_ptr.vmem [resolvable:$true] %s2613_s26 }
  0x5c   : > { %545 = vmatpush.msra.mxu0 %v3537_v2  ;;  %2901 = vmatpush.msra.mxu2 %v3537_v2  ;;  %v3567_v8 = vld [vmem:[%s3508_s27 + $0x30] sm:$0xff]  ;;  %v3572_v9 = vld [vmem:[%s3508_s27 + $0x38] sm:$0xff]  ;;  %v3577_v10 = vld [vmem:[%s3508_s27 + $0x20] sm:$0xff]  ;;  %v629_v23 = vmul.f32 %v3552_v5, %v3552_v5  ;;  %v626_v26 = vmul.f32 %v3557_v6, %v3557_v6  ;;  %v627_v27 = vmul.f32 %v3562_v7, %v3562_v7  ;;  %s2615_s11 = sshll.u32 %s2612_s19, 4  ;;  %s2601_s29 = scalar_lea.sflag [#allocation4], %s3501_s13  ;;  %s2616_s11 = int_to_ptr.hbm [resolvable:$true] %s2615_s11 }
  0x5d   : > { %586 = vmatpush.msra.mxu1 %v3542_v3  ;;  %2909 = vmatpush.msra.mxu3 %v3542_v3  ;;  %v3582_v11 = vld [vmem:[%s3508_s27 + $0x28] sm:$0xff]  ;;  %v3587_v12 = vld [vmem:[%s3508_s27 + $0x10] sm:$0xff]  ;;  %v458_v13 = vld [vmem:[%s3508_s27 + $0x18] sm:$0xff]  ;;  %v624_v28 = vmul.f32 %v3567_v8, %v3567_v8  ;;  %v625_v29 = vmul.f32 %v3572_v9, %v3572_v9  ;;  %v622_v30 = vmul.f32 %v3577_v10, %v3577_v10  ;;  %s3248_s23 = sshra.s32 %s2616_s11, 4  ;;  %s3254_s7 = scalar_lea.hbm %s4804_s10, 256  ;;  %s3249_s23 = int_to_ptr.hbm [resolvable:$true] %s3248_s23 }
  0x5e   : > { %546 = vmatpush.msra.mxu0 %v3547_v4  ;;  %2902 = vmatpush.msra.mxu2 %v3547_v4  ;;  %v3595_v14 = vld [vmem:[%s3508_s27] sm:$0xff]  ;;  %v3600_v15 = vld [vmem:[%s3508_s27 + $0x8] sm:$0xff]  ;;  %v623_v31 = vmul.f32 %v3582_v11, %v3582_v11  ;;  %v3669_v32 = vld [vmem:[%s4796_s2 + $0x10] sm:$0xff]  ;;  %v620_v34 = vmul.f32 %v3587_v12, %v3587_v12  ;;  %v621_v35 = vmul.f32 %v458_v13, %v458_v13  ;;  %s3250_s15 = scalar_lea.hbm %s3249_s23, 128  ;;  %p3255_p2 = scmp.lt.s32.totalorder %s3249_s23, %s4804_s10 }
  0x5f   : > { %587 = vmatpush.msra.mxu1 %v3552_v5  ;;  %2910 = vmatpush.msra.mxu3 %v3552_v5  ;;  %4840 = vst [vmem:[#allocation22_spill] sm:$0xff] %v3595_v14  ;;  %v3605_v16 = vld [vmem:[%s4796_s2] sm:$0xff]  ;;  %v3639_v24 = vld [vmem:[%s4796_s2 + $0x8] sm:$0xff]  ;;  %v3674_v33 = vld [vmem:[%s4796_s2 + $0x30] sm:$0xff]  ;;  %v618_v36 = vmul.f32 %v3595_v14, %v3595_v14  ;;  %v619_v37 = vmul.f32 %v3600_v15, %v3600_v15  ;;  %p3251_p1 = scmp.ne.s32.totalorder %s3249_s23, %s3250_s15  ;;  %p3256_p10 = scmp.lt.s32.totalorder %s3254_s7, %s3250_s15 }
  0x60   : > { %547 = vmatpush.msra.mxu0 %v3557_v6  ;;  %2903 = vmatpush.msra.mxu2 %v3557_v6  ;;  %4841 = vst [vmem:[#allocation23_spill] sm:$0xff] %v3600_v15  ;;  %v3610_v17 = vld [vmem:[%s4796_s2 + $0x20] sm:$0xff]  ;;  %v3644_v25 = vld [vmem:[%s4796_s2 + $0x28] sm:$0xff]  ;;  %v3693_v38 = vld [vmem:[%s4796_s2 + $0x38] sm:$0xff] }
  0x61   : > { %588 = vmatpush.msra.mxu1 %v3562_v7  ;;  %2911 = vmatpush.msra.mxu3 %v3562_v7  ;;  %v3698_v39 = vld [vmem:[%s4796_s2 + $0x18] sm:$0xff]  ;;  %v501_v41 = vld [vmem:[%s4797_s3 + $0x30] sm:$0xff]  ;;  %v500_v44 = vld [vmem:[%s4797_s3 + $0x28] sm:$0xff]  ;;  %p3252_p4 = pnand %p3251_p1, %p3445_p3  ;;  %p3257_p11 = por %p3256_p10, %p3255_p2 }
  0x62   : > { %548 = vmatpush.msra.mxu0 %v3567_v8  ;;  %2904 = vmatpush.msra.mxu2 %v3567_v8  ;;  %v502_v40 = vld [vmem:[%s4797_s3 + $0x38] sm:$0xff]  ;;  %v509_v43 = vld [vmem:[%s4798_s4 + $0x30] sm:$0xff]  ;;  %v508_v45 = vld [vmem:[%s4798_s4 + $0x28] sm:$0xff] }
  0x63   : > { %589 = vmatpush.msra.mxu1 %v3572_v9  ;;  %2912 = vmatpush.msra.mxu3 %v3572_v9  ;;  %v499_v46 = vld [vmem:[%s4797_s3 + $0x20] sm:$0xff]  ;;  %v485_v47 = vld [vmem:[%s3516_s21 + $0x70] sm:$0xff]  ;;  %v486_v48 = vld [vmem:[%s3516_s21 + $0x78] sm:$0xff]  ;;  %p3253_p8 = pneg %p3252_p4 }
  0x64   : > { %549 = vmatpush.msra.mxu0 %v3577_v10  ;;  %2905 = vmatpush.msra.mxu2 %v3577_v10  ;;  %v1131_v49 = vmul.f32 %v485_v47, %v485_v47  ;;  %v1132_v50 = vmul.f32 %v486_v48, %v486_v48  ;;  %v483_v51 = vld [vmem:[%s3516_s21 + $0x60] sm:$0xff]  ;;  %v484_v52 = vld [vmem:[%s3516_s21 + $0x68] sm:$0xff]  ;;  %v481_v56 = vld [vmem:[%s3516_s21 + $0x50] sm:$0xff] }
  0x65   : > { %590 = vmatpush.msra.mxu1 %v3582_v11  ;;  %2913 = vmatpush.msra.mxu3 %v3582_v11  ;;  %v1129_v53 = vmul.f32 %v483_v51, %v483_v51  ;;  %v1130_v54 = vmul.f32 %v484_v52, %v484_v52  ;;  %v507_v55 = vld [vmem:[%s4798_s4 + $0x20] sm:$0xff]  ;;  %v482_v57 = vld [vmem:[%s3516_s21 + $0x58] sm:$0xff]  ;;  %v1127_v59 = vmul.f32 %v481_v56, %v481_v56  ;;  %v480_v62 = vld [vmem:[%s3516_s21 + $0x48] sm:$0xff]  ;;  %p3258_p9 = pnand %p3257_p11, %p3253_p8 }
  0x66   : > { %550 = vmatpush.msra.mxu0 %v3587_v12  ;;  %2906 = vmatpush.msra.mxu2 %v3587_v12  ;;  %v498_v58 = vld [vmem:[%s4797_s3 + $0x18] sm:$0xff]  ;;  %v1128_v60 = vmul.f32 %v482_v57, %v482_v57  ;;  %v479_v61 = vld [vmem:[%s3516_s21 + $0x40] sm:$0xff] }
  0x67   : > { %591 = vmatpush.msra.mxu1 %v458_v13  ;;  %2914 = vmatpush.msra.mxu3 %v458_v13  ;;  %v510_v63 = vld [vmem:[%s4798_s4 + $0x38] sm:$0xff]  ;;  %v1125_v13 = vmul.f32 %v479_v61, %v479_v61 }
  0x68   : > { %551 = vmatpush.msra.mxu0 %v3595_v14  ;;  %2907 = vmatpush.msra.mxu2 %v3595_v14 }
  0x69   : > { %592 = vmatpush.msra.mxu1 %v3600_v15  ;;  %2915 = vmatpush.msra.mxu3 %v3600_v15 }
  0x6a   : > { %2748 = vmatmul.msk.f32.vlgmr.msra.gmra.mxu0 %vm511_vm0, %v3605_v16  ;;  %2752 = vmatmul.msk.f32.vlgmr.msra.gmra.mxu2 %vm511_vm0, %v3610_v17 }
  0x6b   : > { %2756 = vmatmul.msk.f32.vlgmr.msra.gmra.mxu1 %vm511_vm0, %v3605_v16  ;;  %2760 = vmatmul.msk.f32.vlgmr.msra.gmra.mxu3 %vm511_vm0, %v3610_v17 }
  0x6c   : > { %642 = vmatpush.msrb.mxu2 %v632_v18  ;;  %683 = vmatpush.msrb.mxu3 %v633_v19  ;;  %v1126_v18 = vmul.f32 %v480_v62, %v480_v62  ;;  %v477_v19 = vld [vmem:[%s3516_s21 + $0x30] sm:$0xff] }
  0x6d   : > { %2996 = vset.pattern.permute.xlu1 %v3320_v42  ;;  %2997 = vset.pattern.permute.xlu2 %v3320_v42 }
  0x6e   : > { %643 = vmatpush.msrb.mxu2 %v630_v20  ;;  %684 = vmatpush.msrb.mxu3 %v631_v21  ;;  %v478_v20 = vld [vmem:[%s3516_s21 + $0x38] sm:$0xff]  ;;  %v1123_v21 = vmul.f32 %v477_v19, %v477_v19 }
  0x6f   : > { %960 = vperm.xlu1 %2996, %v502_v40   ;;  %955 = vperm.xlu2 %2997, %v501_v41   ;;  %v472_v40 = vld [vmem:[%s3516_s21 + $0x8] sm:$0xff]  ;;  %v497_v41 = vld [vmem:[%s4797_s3 + $0x10] sm:$0xff] }
  0x70   : > { %644 = vmatpush.msrb.mxu2 %v628_v22  ;;  %685 = vmatpush.msrb.mxu3 %v629_v23  ;;  %v1124_v22 = vmul.f32 %v478_v20, %v478_v20  ;;  %v475_v23 = vld [vmem:[%s3516_s21 + $0x20] sm:$0xff] }
  0x71   : > { %2998 = vset.pattern.permute.xlu0 %v3320_v42  ;;  %1043 = vmatpush.msrb.mxu0 %v485_v47 }
  0x72   : > { %2749 = vmatmul.msk.f32.gmra.mxu0 %vm511_vm0, %v3639_v24  ;;  %2753 = vmatmul.msk.f32.gmra.mxu2 %vm511_vm0, %v3644_v25 }
  0x73   : > { %2757 = vmatmul.msk.f32.gmra.mxu1 %vm511_vm0, %v3639_v24  ;;  %2761 = vmatmul.msk.f32.gmra.mxu3 %vm511_vm0, %v3644_v25 }
  0x74   : > { %645 = vmatpush.msrb.mxu2 %v626_v26  ;;  %686 = vmatpush.msrb.mxu3 %v627_v27  ;;  %v476_v26 = vld [vmem:[%s3516_s21 + $0x28] sm:$0xff]  ;;  %v1121_v27 = vmul.f32 %v475_v23, %v475_v23 }
  0x75   : > { %1084 = vmatpush.msrb.mxu1 %v486_v48  ;;  %1044 = vmatpush.msrb.mxu0 %v483_v51 }
  0x76   : > { %646 = vmatpush.msrb.mxu2 %v624_v28  ;;  %687 = vmatpush.msrb.mxu3 %v625_v29  ;;  %v1122_v28 = vmul.f32 %v476_v26, %v476_v26  ;;  %v473_v29 = vld [vmem:[%s3516_s21 + $0x10] sm:$0xff] }
  0x77   : > { %1011 = vperm.xlu1 %2996, %v509_v43   ;;  %950 = vperm.xlu2 %2997, %v500_v44   ;;  %v1118_v43 = vmul.f32 %v472_v40, %v472_v40  ;;  %v505_v44 = vld [vmem:[%s4798_s4 + $0x10] sm:$0xff] }
  0x78   : > { %647 = vmatpush.msrb.mxu2 %v622_v30  ;;  %688 = vmatpush.msrb.mxu3 %v623_v31  ;;  %v496_v30 = vld [vmem:[%s4797_s3 + $0x8] sm:$0xff]  ;;  %v474_v31 = vld [vmem:[%s3516_s21 + $0x18] sm:$0xff] }
  0x79   : > { %1085 = vmatpush.msrb.mxu1 %v484_v52  ;;  %1045 = vmatpush.msrb.mxu0 %v481_v56 }
  0x7a   : > { %2750 = vmatmul.msk.f32.gmra.mxu0 %vm511_vm0, %v3669_v32  ;;  %2754 = vmatmul.msk.f32.gmra.mxu2 %vm511_vm0, %v3674_v33 }
  0x7b   : > { %2758 = vmatmul.msk.f32.gmra.mxu1 %vm511_vm0, %v3669_v32  ;;  %2762 = vmatmul.msk.f32.gmra.mxu3 %vm511_vm0, %v3674_v33 }
  0x7c   : > { %648 = vmatpush.msrb.mxu2 %v620_v34  ;;  %689 = vmatpush.msrb.mxu3 %v621_v35  ;;  %v1119_v34 = vmul.f32 %v473_v29, %v473_v29  ;;  %v506_v35 = vld [vmem:[%s4798_s4 + $0x18] sm:$0xff] }
  0x7d   : > { %1086 = vmatpush.msrb.mxu1 %v482_v57  ;;  %1016 = vperm.xlu0 %2998, %v510_v63  }
  0x7e   : > { %649 = vmatpush.msrb.mxu2 %v618_v36  ;;  %690 = vmatpush.msrb.mxu3 %v619_v37  ;;  %v1120_v36 = vmul.f32 %v474_v31, %v474_v31  ;;  %v471_v37 = vld [vmem:[%s3516_s21] sm:$0xff] }
  0x7f   : > { %1006 = vperm.xlu1 %2996, %v508_v45   ;;  %945 = vperm.xlu2 %2997, %v499_v46   ;;  %v1117_v42 = vmul.f32 %v471_v37, %v471_v37 }
  0x80   : > { %1141 = vmatpush.msra.mxu2 %v1131_v49  ;;  %1182 = vmatpush.msra.mxu3 %v1132_v50 }
  0x81   : > { %1046 = vmatpush.msrb.mxu0 %v479_v61  ;;  %1087 = vmatpush.msrb.mxu1 %v480_v62 }
  0x82   : > { %2755 = vmatmul.msk.f32.gmra.mxu2 %vm511_vm0, %v3693_v38  ;;  %2751 = vmatmul.msk.f32.gmra.mxu0 %vm511_vm0, %v3698_v39 }
  0x83   : > { %2763 = vmatmul.msk.f32.gmra.mxu3 %vm511_vm0, %v3693_v38  ;;  %2759 = vmatmul.msk.f32.gmra.mxu1 %vm511_vm0, %v3698_v39 }
  0x84   : > { %1142 = vmatpush.msra.mxu2 %v1129_v53  ;;  %1183 = vmatpush.msra.mxu3 %v1130_v54 }
  0x85   : > { %1047 = vmatpush.msrb.mxu0 %v477_v19  ;;  %1088 = vmatpush.msrb.mxu1 %v478_v20 }
  0x86   : > { %1143 = vmatpush.msra.mxu2 %v1127_v59  ;;  %1184 = vmatpush.msra.mxu3 %v1128_v60 }
  0x87   : > { %1001 = vperm.xlu1 %2996, %v507_v55   ;;  %940 = vperm.xlu2 %2997, %v498_v58  }
  0x88   : > { %1144 = vmatpush.msra.mxu2 %v1125_v13  ;;  %1185 = vmatpush.msra.mxu3 %v1126_v18 }
  0x89   : > { %1048 = vmatpush.msrb.mxu0 %v475_v23  ;;  %1089 = vmatpush.msrb.mxu1 %v476_v26 }
  0x8a   : > { %2764 = vmatmul.msk.f32.vlgmr.msrb.gmra.mxu2 %vm511_vm0, %v3605_v16  ;;  %1186 = vmatpush.msra.mxu3 %v1124_v22 }
  0x8b   : > { %2772 = vmatmul.msk.f32.vlgmr.msrb.gmra.mxu3 %vm511_vm0, %v3605_v16  ;;  %1145 = vmatpush.msra.mxu2 %v1123_v21 }
  0x8c   : > { %1187 = vmatpush.msra.mxu3 %v1122_v28  ;;  %1049 = vmatpush.msrb.mxu0 %v473_v29 }
  0x8d   : > { %1146 = vmatpush.msra.mxu2 %v1121_v27  ;;  %1090 = vmatpush.msrb.mxu1 %v474_v31 }
  0x8e   : > { %1188 = vmatpush.msra.mxu3 %v1120_v36  ;;  %935 = vperm.xlu0 %2998, %v497_v41  }
  0x8f   : > { %930 = vperm.xlu1 %2996, %v496_v30   ;;  %996 = vperm.xlu2 %2997, %v506_v35  }
  0x90   : > { %1147 = vmatpush.msra.mxu2 %v1119_v34  ;;  %1050 = vmatpush.msrb.mxu0 %v471_v37 }
  0x91   : > { %1091 = vmatpush.msrb.mxu1 %v472_v40  ;;  %2780 = vmatmul.msk.f32.vlgmr.msrb.gmra.mxu0 %vm511_vm0, %v3605_v16 }
  0x92   : > { %2765 = vmatmul.msk.f32.gmra.mxu2 %vm511_vm0, %v3639_v24  ;;  %2788 = vmatmul.msk.f32.vlgmr.msrb.gmra.mxu1 %vm511_vm0, %v3605_v16 }
  0x93   : > { %2773 = vmatmul.msk.f32.gmra.mxu3 %vm511_vm0, %v3639_v24  ;;  %1148 = vmatpush.msra.mxu2 %v1117_v42 }
  0x94   : > { %1189 = vmatpush.msra.mxu3 %v1118_v43 }
  0x96   : > { %991 = vperm.xlu0 %2998, %v505_v44  }
  0x99   : > { %2781 = vmatmul.msk.f32.gmra.mxu0 %vm511_vm0, %v3639_v24 }
  0x9a   : > { %2766 = vmatmul.msk.f32.gmra.mxu2 %vm511_vm0, %v3669_v32  ;;  %2789 = vmatmul.msk.f32.gmra.mxu1 %vm511_vm0, %v3639_v24 }
  0x9b   : > { %2774 = vmatmul.msk.f32.gmra.mxu3 %vm511_vm0, %v3669_v32 }
  0xa1   : > { %2782 = vmatmul.msk.f32.gmra.mxu0 %vm511_vm0, %v3669_v32 }
  0xa2   : > { %2767 = vmatmul.msk.f32.gmra.mxu2 %vm511_vm0, %v3698_v39  ;;  %2790 = vmatmul.msk.f32.gmra.mxu1 %vm511_vm0, %v3669_v32 }
  0xa3   : > { %2775 = vmatmul.msk.f32.gmra.mxu3 %vm511_vm0, %v3698_v39 }
  0xa9   : > { %2783 = vmatmul.msk.f32.gmra.mxu0 %vm511_vm0, %v3698_v39 }
  0xaa   : > { %2768 = vmatmul.msk.f32.gmra.mxu2 %vm511_vm0, %v3610_v17  ;;  %2791 = vmatmul.msk.f32.gmra.mxu1 %vm511_vm0, %v3698_v39 }
  0xab   : > { %2776 = vmatmul.msk.f32.gmra.mxu3 %vm511_vm0, %v3610_v17 }
  0xb1   : > { %2784 = vmatmul.msk.f32.gmra.mxu0 %vm511_vm0, %v3610_v17 }
  0xb2   : > { %2769 = vmatmul.msk.f32.gmra.mxu2 %vm511_vm0, %v3644_v25  ;;  %2792 = vmatmul.msk.f32.gmra.mxu1 %vm511_vm0, %v3610_v17 }
  0xb3   : > { %2777 = vmatmul.msk.f32.gmra.mxu3 %vm511_vm0, %v3644_v25 }
  0xb9   : > { %2785 = vmatmul.msk.f32.gmra.mxu0 %vm511_vm0, %v3644_v25 }
  0xba   : > { %2770 = vmatmul.msk.f32.gmra.mxu2 %vm511_vm0, %v3674_v33  ;;  %2793 = vmatmul.msk.f32.gmra.mxu1 %vm511_vm0, %v3644_v25 }
  0xbb   : > { %2778 = vmatmul.msk.f32.gmra.mxu3 %vm511_vm0, %v3674_v33 }
  0xc1   : > { %2786 = vmatmul.msk.f32.gmra.mxu0 %vm511_vm0, %v3674_v33 }
  0xc2   : > { %2771 = vmatmul.msk.f32.gmra.mxu2 %vm511_vm0, %v3693_v38  ;;  %2794 = vmatmul.msk.f32.gmra.mxu1 %vm511_vm0, %v3674_v33 }
  0xc3   : > { %2779 = vmatmul.msk.f32.gmra.mxu3 %vm511_vm0, %v3693_v38 }
  0xc9   : > { %2787 = vmatmul.msk.f32.gmra.mxu0 %vm511_vm0, %v3693_v38 }
  0xca   : > { %2796 = vmatmul.msk.f32.vlgmr.msra.gmra.mxu2 %vm511_vm0, %v3605_v16  ;;  %2795 = vmatmul.msk.f32.gmra.mxu1 %vm511_vm0, %v3693_v38 }
  0xcb   : > { %2804 = vmatmul.msk.f32.vlgmr.msra.gmra.mxu3 %vm511_vm0, %v3605_v16 }
  0xd2   : > { %2797 = vmatmul.msk.f32.gmra.mxu2 %vm511_vm0, %v3639_v24 }
  0xd3   : > { %2805 = vmatmul.msk.f32.gmra.mxu3 %vm511_vm0, %v3639_v24 }
  0xda   : > { %2798 = vmatmul.msk.f32.gmra.mxu2 %vm511_vm0, %v3669_v32 }
  0xdb   : > { %2806 = vmatmul.msk.f32.gmra.mxu3 %vm511_vm0, %v3669_v32 }
  0xe2   : > { %2799 = vmatmul.msk.f32.gmra.mxu2 %vm511_vm0, %v3698_v39 }
  0xe3   : > { %2807 = vmatmul.msk.f32.gmra.mxu3 %vm511_vm0, %v3698_v39 }
  0xe7   : > { %v553_v16 = vpop.f32.mrf.mxu0 }
  0xe8   : > { %v594_v24 = vpop.f32.mrf.mxu1 }
  0xe9   : > { %v716_v32 = vadd.f32 %v594_v24, %v553_v16 }
  0xea   : > { %2800 = vmatmul.msk.f32.gmra.mxu2 %vm511_vm0, %v3610_v17 }
  0xeb   : > { %2808 = vmatmul.msk.f32.gmra.mxu3 %vm511_vm0, %v3610_v17  ;;  %717 = vadd.xlane.f32.xlu1 %v716_v32 }
  0xed   : > { %v565_v45 = vpop.f32.mrf.mxu2 }
  0xee   : > { %v606_v46 = vpop.f32.mrf.mxu3 }
  0xef   : > { %v556_v47 = vpop.f32.mrf.mxu0  ;;  %v728_v39 = vadd.f32 %v606_v46, %v565_v45 }
  0xf0   : > { %v597_v48 = vpop.f32.mrf.mxu1 }
  0xf1   : > { %729 = vadd.xlane.f32.xlu2 %v728_v39  ;;  %v719_v50 = vadd.f32 %v597_v48, %v556_v47  ;;  %v503_v47 = vld [vmem:[%s4798_s4] sm:$0xff] }
  0xf2   : > { %2801 = vmatmul.msk.f32.gmra.mxu2 %vm511_vm0, %v3644_v25 }
  0xf3   : > { %2809 = vmatmul.msk.f32.gmra.mxu3 %vm511_vm0, %v3644_v25 }
  0xf5   : > { %v568_v49 = vpop.f32.mrf.mxu2 }
  0xf6   : > { %v609_v51 = vpop.f32.mrf.mxu3 }
  0xf7   : > { %v559_v52 = vpop.f32.mrf.mxu0  ;;  %v731_v53 = vadd.f32 %v609_v51, %v568_v49 }
  0xf8   : > { %v600_v54 = vpop.f32.mrf.mxu1 }
  0xf9   : > { %732 = vadd.xlane.f32.xlu1 %v731_v53  ;;  %v722_v17 = vadd.f32 %v600_v54, %v559_v52  ;;  %720 = vadd.xlane.f32.xlu2 %v719_v50  ;;  %v495_v53 = vld [vmem:[%s4797_s3] sm:$0xff]  ;;  %v3881_v54 = vpop.permute.xlu1 %960 }
  0xfa   : > { %2802 = vmatmul.msk.f32.gmra.mxu2 %vm511_vm0, %v3674_v33 }
  0xfb   : > { %2810 = vmatmul.msk.f32.gmra.mxu3 %vm511_vm0, %v3674_v33  ;;  %723 = vadd.xlane.f32.xlu0 %v722_v17  ;;  %v3883_v17 = vpop.permute.xlu2 %955 }
  0xfd   : > { %v571_v55 = vpop.f32.mrf.mxu2 }
  0xfe   : > { %v612_v56 = vpop.f32.mrf.mxu3 }
  0xff   : > { %v562_v57 = vpop.f32.mrf.mxu0  ;;  %v734_v58 = vadd.f32 %v612_v56, %v571_v55 }
 0x100   : > { %v603_v25 = vpop.f32.mrf.mxu1 }
 0x101   : > { %v725_v59 = vadd.f32 %v603_v25, %v562_v57 }
 0x102   : > { %2803 = vmatmul.msk.f32.gmra.mxu2 %vm511_vm0, %v3693_v38 }
 0x103   : > { %2811 = vmatmul.msk.f32.gmra.mxu3 %vm511_vm0, %v3693_v38  ;;  %735 = vadd.xlane.f32.xlu0 %v734_v58  ;;  %v504_v58 = vld [vmem:[%s4798_s4 + $0x8] sm:$0xff] }
 0x104   : > { %726 = vadd.xlane.f32.xlu1 %v725_v59  ;;  %v3888_v59 = vpop.permute.xlu0 %1016 }
 0x105   : > { %v574_v60 = vpop.f32.mrf.mxu2 }
 0x106   : > { %v615_v61 = vpop.f32.mrf.mxu3 }
 0x107   : > { %v737_v62 = vadd.f32 %v615_v61, %v574_v60  ;;  %v3890_v60 = vpop.permute.xlu1 %1011 }
 0x10b   : > { %738 = vadd.xlane.f32.xlu0 %v737_v62  ;;  %v3894_v62 = vpop.permute.xlu2 %950 }
 0x10d   : > { %v651_v33 = vpop.f32.mrf.mxu2 }
 0x10e   : > { %v692_v63 = vpop.f32.mrf.mxu3  ;;  %v3859_v31 = vpop.f32.mrf.mxu0 }
 0x10f   : > { %v755_v13 = vadd.f32 %v692_v63, %v651_v33  ;;  %v3861_v35 = vpop.f32.mrf.mxu1 }
 0x113   : > { %756 = vadd.xlane.f32.xlu0 %v755_v13 }
 0x115   : > { %v654_v18 = vpop.f32.mrf.mxu2 }
 0x116   : > { %v695_v19 = vpop.f32.mrf.mxu3  ;;  %v3863_v42 = vpop.f32.mrf.mxu0 }
 0x117   : > { %v758_v20 = vadd.f32 %v695_v19, %v654_v18  ;;  %v3865_v44 = vpop.f32.mrf.mxu1  ;;  %v3898_v18 = vpop.permute.xlu0 %935 }
 0x118   : > { %v3900_v19 = vpop.permute.xlu1 %1006 }
 0x119   : > { %759 = vadd.xlane.f32.xlu2 %v758_v20 }
 0x11d   : > { %v657_v21 = vpop.f32.mrf.mxu2 }
 0x11e   : > { %v698_v22 = vpop.f32.mrf.mxu3  ;;  %v1058_v45 = vpop.f32.mrf.mxu0 }
 0x11f   : > { %v761_v23 = vadd.f32 %v698_v22, %v657_v21  ;;  %v1099_v46 = vpop.f32.mrf.mxu1  ;;  %v3902_v22 = vpop.permute.xlu2 %945 }
 0x121   : > { %762 = vadd.xlane.f32.xlu0 %v761_v23 }
 0x125   : > { %v660_v26 = vpop.f32.mrf.mxu2 }
 0x126   : > { %v701_v38 = vpop.f32.mrf.mxu3  ;;  %v1061_v49 = vpop.f32.mrf.mxu0 }
 0x127   : > { %v764_v27 = vadd.f32 %v701_v38, %v660_v26  ;;  %v1102_v50 = vpop.f32.mrf.mxu1  ;;  %v1221_v38 = vadd.f32 %v1099_v46, %v1058_v45 }
 0x129   : > { %765 = vadd.xlane.f32.xlu1 %v764_v27 }
 0x12d   : > { %v663_v28 = vpop.f32.mrf.mxu2 }
 0x12e   : > { %v704_v29 = vpop.f32.mrf.mxu3  ;;  %v1064_v55 = vpop.f32.mrf.mxu0 }
 0x12f   : > { %v767_v30 = vadd.f32 %v704_v29, %v663_v28  ;;  %v1105_v57 = vpop.f32.mrf.mxu1  ;;  %v3904_v28 = vpop.permute.xlu0 %991 }
 0x130   : > { %4842 = vst [vmem:[#allocation24_spill] sm:$0xff] %v3904_v28 }
 0x131   : > { %768 = vadd.xlane.f32.xlu2 %v767_v30  ;;  %v3906_v30 = vpop.permute.xlu1 %1001 }
 0x135   : > { %v666_v34 = vpop.f32.mrf.mxu2 }
 0x136   : > { %v707_v36 = vpop.f32.mrf.mxu3  ;;  %v1067_v63 = vpop.f32.mrf.mxu0 }
 0x137   : > { %v770_v37 = vadd.f32 %v707_v36, %v666_v34  ;;  %v1108_v13 = vpop.f32.mrf.mxu1  ;;  %v3908_v34 = vpop.permute.xlu2 %940 }
 0x139   : > { %771 = vadd.xlane.f32.xlu0 %v770_v37 }
 0x13d   : > { %v669_v40 = vpop.f32.mrf.mxu2 }
 0x13e   : > { %v710_v41 = vpop.f32.mrf.mxu3  ;;  %v1070_v23 = vpop.f32.mrf.mxu0 }
 0x13f   : > { %v773_v43 = vadd.f32 %v710_v41, %v669_v40  ;;  %v1111_v26 = vpop.f32.mrf.mxu1  ;;  %v3912_v45 = vpop.permute.xlu2 %996 }
 0x140   : > { %4844 = vst [vmem:[#allocation26_spill] sm:$0xff] %v3912_v45  ;;  %v1233_v28 = vadd.f32 %v1111_v26, %v1070_v23 }
 0x141   : > { %774 = vadd.xlane.f32.xlu2 %v773_v43 }
 0x145   : > { %v672_v16 = vpop.f32.mrf.mxu2 }
 0x146   : > { %v713_v24 = vpop.f32.mrf.mxu3  ;;  %v1073_v37 = vpop.f32.mrf.mxu0 }
 0x147   : > { %v776_v32 = vadd.f32 %v713_v24, %v672_v16  ;;  %v1114_v40 = vpop.f32.mrf.mxu1 }
 0x148   : > { %v1236_v24 = vadd.f32 %v1114_v40, %v1073_v37  ;;  %v1227_v40 = vadd.f32 %v1105_v57, %v1064_v55 }
 0x149   : > { %777 = vadd.xlane.f32.xlu1 %v776_v32  ;;  %v3910_v32 = vpop.permute.xlu1 %930 }
 0x14a   : > { %4843 = vst [vmem:[#allocation25_spill] sm:$0xff] %v3910_v32 }
 0x14d   : > { %981 = vperm.xlu0 %2998, %v503_v47   ;;  %v3870_v39 = vpop.f32.mrf.mxu2 }
 0x14e   : > { %v3872_v48 = vpop.f32.mrf.mxu3 }
 0x14f   : > { %v1247_v23 = vadd.f32 %v3872_v48, %v3870_v39 }
 0x155   : > { %v3874_v51 = vpop.f32.mrf.mxu2 }
 0x156   : > { %v3876_v52 = vpop.f32.mrf.mxu3 }
 0x159   : > { %925 = vperm.xlu2 %2997, %v495_v53   ;;  %v1230_v53 = vadd.f32 %v1108_v13, %v1067_v63 }
 0x15d   : > { %v1156_v56 = vpop.f32.mrf.mxu2 }
 0x15e   : > { %v1197_v25 = vpop.f32.mrf.mxu3 }
 0x162   : > { %986 = vperm.xlu1 %2996, %v504_v58  }
 0x164   : > { %v730_v37 = vpop.xlane.xlu2 %729 }
 0x165   : > { %v3892_v61 = vpop.f32.mrf.mxu2 }
 0x166   : > { %v3896_v33 = vpop.f32.mrf.mxu3 }
 0x16d   : > { %v1162_v20 = vpop.f32.mrf.mxu2 }
 0x16e   : > { %v1203_v21 = vpop.f32.mrf.mxu3  ;;  %v724_v43 = vpop.xlane.xlu0 %723 }
 0x16f   : > { %v1259_v26 = vadd.f32 %v1203_v21, %v1162_v20 }
 0x175   : > { %v1165_v27 = vpop.f32.mrf.mxu2 }
 0x176   : > { %v1206_v29 = vpop.f32.mrf.mxu3 }
 0x177   : > { %1222 = vadd.xlane.f32.xlu0 %v1221_v38  ;;  %v1262_v36 = vadd.f32 %v1206_v29, %v1165_v27  ;;  %v3914_v38 = vpop.xlane.xlu0 %735  ;;  %v718_v27 = vpop.xlane.xlu1 %717  ;;  %v3321_v29 = vmov 256.0  }
 0x178   : > { %2999 = vrcp.f32 %v3321_v29 }
 0x17d   : > { %v1168_v41 = vpop.f32.mrf.mxu2 }
 0x17e   : > { %v1209_v16 = vpop.f32.mrf.mxu3  ;;  %v3000_v32 = vpop.eup %2999 }
 0x17f   : > { %1263 = vadd.xlane.f32.xlu0 %v1262_v36  ;;  %v1253_v36 = vadd.f32 %v1197_v25, %v1156_v56  ;;  %v3916_v45 = vpop.xlane.xlu0 %738  ;;  %v741_v63 = vmul.f32 256.0, %v3000_v32  ;;  %v733_v13 = vpop.xlane.xlu1 %732  ;;  %vm745_vm1 = vweird.f32 %v3000_v32 }
 0x182   : > { %1237 = vadd.xlane.f32.xlu2 %v1236_v24  ;;  %v1224_v24 = vadd.f32 %v1102_v50, %v1061_v49  ;;  %v1218_v49 = vadd.f32 %v3865_v44, %v3863_v42 }
 0x185   : > { %v1171_v46 = vpop.f32.mrf.mxu2 }
 0x186   : > { %v1212_v47 = vpop.f32.mrf.mxu3 }
 0x187   : > { %v1268_v58 = vadd.f32 %v1212_v47, %v1171_v46  ;;  %v721_v46 = vpop.xlane.xlu2 %720  ;;  %v742_v47 = vsub.f32 1.0, %v741_v63  ;;  %v727_v55 = vpop.xlane.xlu1 %726 }
 0x188   : > { %v757_v57 = vpop.xlane.xlu0 %756 }
 0x189   : > { %1269 = vadd.xlane.f32.xlu0 %v1268_v58  ;;  %v743_v56 = vmul.f32 %v3000_v32, %v742_v47 }
 0x18a   : > { %1231 = vadd.xlane.f32.xlu2 %v1230_v53  ;;  %v1265_v53 = vadd.f32 %v1209_v16, %v1168_v41  ;;  %v1250_v41 = vadd.f32 %v3876_v52, %v3874_v51 }
 0x18b   : > { %v744_v50 = vadd.f32 %v3000_v32, %v743_v56 }
 0x18c   : > { %1234 = vadd.xlane.f32.xlu1 %v1233_v28  ;;  %v1256_v28 = vadd.f32 %v3896_v33, %v3892_v61 }
 0x18d   : > { %v3924_v39 = vsel %vm745_vm1, %v3000_v32, %v744_v50  ;;  %v1215_v32 = vadd.f32 %v3861_v35, %v3859_v31 }
 0x18e   : > { %4845 = vst [vmem:[#allocation27_spill] sm:$0xff] %v3924_v39  ;;  %v3927_v20 = vmul.f32 %v3924_v39, %v727_v55  ;;  %v3932_v42 = vmul.f32 %v3924_v39, %v730_v37  ;;  %v3935_v16 = vmul.f32 %v3924_v39, %v724_v43  ;;  %v3943_v58 = vmul.f32 %v3924_v39, %v733_v13 }
 0x18f   : > { %v760_v25 = vpop.xlane.xlu2 %759  ;;  %v3946_v51 = vmul.f32 %v3924_v39, %v718_v27  ;;  %v3952_v29 = vmul.f32 %v3924_v39, %v721_v46  ;;  %v779_v63 = vmul.f32 %v757_v57, %v3924_v39  ;;  %v3970_v56 = vmul.f32 %v3924_v39, %v3914_v38 }
 0x190   : > { %v790_v61 = vmul.f32 %v3927_v20, %v3927_v20  ;;  %v791_v43 = vmul.f32 %v3932_v42, %v3932_v42  ;;  %v789_v37 = vmul.f32 %v3935_v16, %v3935_v16  ;;  %v792_v27 = vmul.f32 %v3943_v58, %v3943_v58 }
 0x191   : > { %1254 = vadd.xlane.f32.xlu0 %v1253_v36  ;;  %4846 = vst [vmem:[#allocation28_spill] sm:$0xff] %v3946_v51 }
 0x192   : > { %1228 = vadd.xlane.f32.xlu2 %v1227_v40 }
 0x194   : > { %1225 = vadd.xlane.f32.xlu1 %v1224_v24  ;;  %v763_v48 = vpop.xlane.xlu0 %762  ;;  %v787_v24 = vmul.f32 %v3946_v51, %v3946_v51 }
 0x195   : > { %v781_v31 = vmul.f32 %v763_v48, %v3924_v39 }
 0x197   : > { %v797_v47 = vsub.f32 %v781_v31, %v789_v37 }
 0x199   : > { %1248 = vadd.xlane.f32.xlu0 %v1247_v23  ;;  %v788_v23 = vmul.f32 %v3952_v29, %v3952_v29 }
 0x19a   : > { %1260 = vadd.xlane.f32.xlu2 %v1259_v26  ;;  %v780_v26 = vmul.f32 %v760_v25, %v3924_v39 }
 0x19c   : > { %1266 = vadd.xlane.f32.xlu1 %v1265_v53  ;;  %v766_v21 = vpop.xlane.xlu1 %765  ;;  %v796_v57 = vsub.f32 %v780_v26, %v788_v23 }
 0x19d   : > { %v782_v33 = vmul.f32 %v766_v21, %v3924_v39  ;;  %v793_v21 = vmul.f32 %v3970_v56, %v3970_v56 }
 0x19f   : > { %v798_v35 = vsub.f32 %v782_v33, %v790_v61  ;;  %v3991_v61 = vmul.f32 %v3924_v39, %v3916_v45 }
 0x1a1   : > { %v3966_v53 = vadd.f32 1e-05, %v798_v35  ;;  %v794_v31 = vmul.f32 %v3991_v61, %v3991_v61  ;;  %v817_v15 = vsub.f32 %v3531_v0, %v3991_v61 }
 0x1a2   : > { %1219 = vadd.xlane.f32.xlu2 %v1218_v49  ;;  %v795_v49 = vsub.f32 %v779_v63, %v787_v24 }
 0x1a3   : > { %3001 = vrsqrt.f32 %v3966_v53  ;;  %vm863_vm6 = vweird.f32 %v3966_v53 }
 0x1a4   : > { %1257 = vadd.xlane.f32.xlu1 %v1256_v28  ;;  %v769_v44 = vpop.xlane.xlu2 %768  ;;  %v3976_v28 = vadd.f32 1e-05, %v797_v47  ;;  %v3983_v38 = vadd.f32 1e-05, %v795_v49 }
 0x1a5   : > { %v783_v52 = vmul.f32 %v769_v44, %v3924_v39  ;;  %v3986_v44 = vadd.f32 1e-05, %v796_v57 }
 0x1a6   : > { %vm833_vm1 = vweird.f32 %v3983_v38 }
 0x1a7   : > { %v799_v13 = vsub.f32 %v783_v52, %v791_v43  ;;  %vm843_vm12 = vweird.f32 %v3986_v44 }
 0x1a9   : > { %v3974_v50 = vadd.f32 1e-05, %v799_v13 }
 0x1aa   : > { %1251 = vadd.xlane.f32.xlu2 %v1250_v41 }
 0x1ab   : > { %vm873_vm14 = vweird.f32 %v3974_v50 }
 0x1ac   : > { %v772_v36 = vpop.xlane.xlu0 %771  ;;  %1216 = vadd.xlane.f32.xlu1 %v1215_v32  ;;  %v3995_v32 = vpop.eup %3001 }
 0x1ad   : > { %v784_v40 = vmul.f32 %v772_v36, %v3924_v39  ;;  %vm864_vm3 = vweird.f32 %v3995_v32 }
 0x1ae   : > { %vm4074_vm9 = vmor %vm863_vm6, %vm864_vm3 }
 0x1af   : > { %v800_v46 = vsub.f32 %v784_v40, %v792_v27  ;;  %v858_v27 = vmul.f32 %v3995_v32, %v3966_v53 }
 0x1b1   : > { %v3972_v55 = vadd.f32 1e-05, %v800_v46  ;;  %v859_v57 = vmul.f32 %v3995_v32, %v858_v27 }
 0x1b3   : > { %3003 = vrsqrt.f32 %v3972_v55  ;;  %vm883_vm10 = vweird.f32 %v3972_v55 }
 0x1b4   : > { %v775_v48 = vpop.xlane.xlu2 %774  ;;  %3005 = vrsqrt.f32 %v3974_v50 }
 0x1b5   : > { %v785_v25 = vmul.f32 %v775_v48, %v3924_v39  ;;  %3007 = vrsqrt.f32 %v3976_v28 }
 0x1b6   : > { %3009 = vrsqrt.f32 %v3983_v38 }
 0x1b7   : > { %v801_v41 = vsub.f32 %v785_v25, %v793_v21  ;;  %v860_v25 = vmul.f32 0.5, %v859_v57 }
 0x1b9   : > { %v3993_v33 = vadd.f32 1e-05, %v801_v41  ;;  %v3998_v52 = vpop.eup %3003 }
 0x1ba   : > { %v4001_v43 = vpop.eup %3005  ;;  %v878_v36 = vmul.f32 %v3998_v52, %v3972_v55  ;;  %vm884_vm4 = vweird.f32 %v3998_v52 }
 0x1bb   : > { %3011 = vrsqrt.f32 %v3993_v33  ;;  %v4007_v35 = vpop.eup %3007  ;;  %v868_v40 = vmul.f32 %v4001_v43, %v3974_v50  ;;  %vm893_vm5 = vweird.f32 %v3993_v33  ;;  %vm874_vm7 = vweird.f32 %v4001_v43  ;;  %vm885_vm15 = vmor %vm883_vm10, %vm884_vm4 }
 0x1bc   : > { %3013 = vrsqrt.f32 %v3986_v44  ;;  %v778_v37 = vpop.xlane.xlu1 %777  ;;  %v4015_v63 = vpop.eup %3009  ;;  %v848_v46 = vmul.f32 %v4007_v35, %v3976_v28  ;;  %v879_v47 = vmul.f32 %v3998_v52, %v878_v36  ;;  %v861_v36 = vsub.f32 1.5, %v860_v25 }
 0x1bd   : > { %v786_v45 = vmul.f32 %v778_v37, %v3924_v39  ;;  %v869_v48 = vmul.f32 %v4001_v43, %v868_v40  ;;  %v828_v37 = vmul.f32 %v4015_v63, %v3983_v38  ;;  %vm854_vm13 = vweird.f32 %v4007_v35 }
 0x1be   : > { %v880_v40 = vmul.f32 0.5, %v879_v47  ;;  %vm853_vm4 = vweird.f32 %v3976_v28 }
 0x1bf   : > { %v802_v24 = vsub.f32 %v786_v45, %v794_v31  ;;  %v849_v45 = vmul.f32 %v4007_v35, %v848_v46  ;;  %v870_v39 = vmul.f32 0.5, %v869_v48  ;;  %v816_v48 = vsub.f32 %v3542_v3, %v3970_v56 }
 0x1c0   : > { %v881_v46 = vsub.f32 1.5, %v880_v40 }
 0x1c1   : > { %v3012_v13 = vpop.eup %3011  ;;  %v4019_v23 = vadd.f32 1e-05, %v802_v24  ;;  %v850_v57 = vmul.f32 0.5, %v849_v45 }
 0x1c2   : > { %v4021_v26 = vpop.eup %3013  ;;  %v888_v49 = vmul.f32 %v3012_v13, %v3993_v33  ;;  %vm894_vm2 = vweird.f32 %v3012_v13  ;;  %v882_v40 = vmul.f32 %v3998_v52, %v881_v46 }
 0x1c3   : > { %3015 = vrsqrt.f32 %v4019_v23  ;;  %v838_v31 = vmul.f32 %v4021_v26, %v3986_v44  ;;  %v851_v0 = vsub.f32 1.5, %v850_v57  ;;  %vm895_vm8 = vmor %vm893_vm5, %vm894_vm2  ;;  %vm903_vm3 = vweird.f32 %v4019_v23 }
 0x1c4   : > { %v889_v21 = vmul.f32 %v3012_v13, %v888_v49  ;;  %v829_v49 = vmul.f32 %v4015_v63, %v828_v37  ;;  %v871_v37 = vsub.f32 1.5, %v870_v39  ;;  %vm875_vm2 = vmor %vm873_vm14, %vm874_vm7  ;;  %v886_v55 = vsel %vm885_vm15, %v3998_v52, %v882_v40 }
 0x1c5   : > { %v839_v41 = vmul.f32 %v4021_v26, %v838_v31  ;;  %v810_v31 = vsub.f32 %v3572_v9, %v3927_v20  ;;  %v852_v53 = vmul.f32 %v4007_v35, %v851_v0  ;;  %vm844_vm6 = vweird.f32 %v4021_v26  ;;  %vm855_vm7 = vmor %vm853_vm4, %vm854_vm13 }
 0x1c6   : > { %v890_v24 = vmul.f32 0.5, %v889_v21  ;;  %v815_v21 = vsub.f32 %v3537_v2, %v3970_v56  ;;  %v809_v2 = vsub.f32 %v3567_v8, %v3927_v20  ;;  %v830_v56 = vmul.f32 0.5, %v829_v49 }
 0x1c7   : > { %v840_v14 = vmul.f32 0.5, %v839_v41  ;;  %v862_v8 = vmul.f32 %v3995_v32, %v861_v36  ;;  %v872_v9 = vmul.f32 %v4001_v43, %v871_v37 }
 0x1c8   : > { %v891_v27 = vsub.f32 1.5, %v890_v24  ;;  %v818_v24 = vsub.f32 %v3534_v1, %v3991_v61 }
 0x1c9   : > { %v3016_v47 = vpop.eup %3015  ;;  %v841_v61 = vsub.f32 1.5, %v840_v14  ;;  %v831_v14 = vsub.f32 1.5, %v830_v56  ;;  %v876_v41 = vsel %vm875_vm2, %v4001_v43, %v872_v9  ;;  %v866_v36 = vsel %vm4074_vm9, %v3995_v32, %v862_v8  ;;  %vm845_vm9 = vmor %vm843_vm12, %vm844_vm6  ;;  %v3081_v9 = vld [vmem:[%s3508_s27 + $0x18] sm:$0xff] }
 0x1ca   : > { %v898_v51 = vmul.f32 %v3016_v47, %v4019_v23  ;;  %v892_v45 = vmul.f32 %v3012_v13, %v891_v27  ;;  %vm904_vm11 = vweird.f32 %v3016_v47  ;;  %v4849_v27 = vsub.f32 %v3547_v4, %v3943_v58 }
 0x1cb   : > { %vm905_vm5 = vmor %vm903_vm3, %vm904_vm11  ;;  %v4850_v43 = vsub.f32 %v3552_v5, %v3943_v58  ;;  %v842_v28 = vmul.f32 %v4021_v26, %v841_v61  ;;  %v4852_v32 = vsub.f32 %v3562_v7, %v3932_v42  ;;  %v832_v58 = vmul.f32 %v4015_v63, %v831_v14  ;;  %v4151_v14 = vpop.permute.xlu2 %925 }
 0x1cc   : > { %v899_v3 = vmul.f32 %v3016_v47, %v898_v51  ;;  %v896_v51 = vsel %vm895_vm8, %v3012_v13, %v892_v45  ;;  %v917_v49 = vmul.f32 %v886_v55, %v4849_v27  ;;  %vm834_vm8 = vweird.f32 %v4015_v63 }
 0x1cd   : > { %v919_v13 = vmul.f32 %v896_v51, %v815_v21  ;;  %v920_v25 = vmul.f32 %v896_v51, %v816_v48  ;;  %v918_v46 = vmul.f32 %v886_v55, %v4850_v43  ;;  %v916_v57 = vmul.f32 %v876_v41, %v4852_v32  ;;  %vm835_vm10 = vmor %vm833_vm1, %vm834_vm8 }
 0x1ce   : > { %v900_v1 = vmul.f32 0.5, %v899_v3  ;;  %v914_v37 = vmul.f32 %v866_v36, %v810_v31  ;;  %v4854_v56 = vsub.f32 %v3582_v11, %v3935_v16  ;;  %v846_v0 = vsel %vm845_vm9, %v4021_v26, %v842_v28 }
 0x1cf   : > { %v976_v5 = vmul.f32 %v3883_v17, %v920_v25  ;;  %v974_v45 = vmul.f32 %v3894_v62, %v918_v46  ;;  %v972_v8 = vmul.f32 %v3902_v22, %v916_v57  ;;  %v836_v39 = vsel %vm835_vm10, %v4015_v63, %v832_v58  ;;  %v4857_v25 = vld [vmem:[#allocation28_spill] sm:$0xff] }
 0x1d0   : > { %v901_v20 = vsub.f32 1.5, %v900_v1  ;;  %v970_v26 = vmul.f32 %v3908_v34, %v914_v37  ;;  %v4855_v51 = vsub.f32 %v3587_v12, %v3952_v29  ;;  %v4862_v46 = vld [vmem:[#allocation24_spill] sm:$0xff] }
 0x1d1   : > { %v1032_v1 = vadd.f32 %v3890_v60, %v976_v5  ;;  %v1030_v38 = vadd.f32 %v3900_v19, %v974_v45  ;;  %v4864_v45 = vld [vmem:[#allocation27_spill] sm:$0xff] }
 0x1d2   : > { %v902_v33 = vmul.f32 %v3016_v47, %v901_v20  ;;  %v909_v63 = vmul.f32 %v846_v0, %v4855_v51 }
 0x1d4   : > { %v906_v50 = vsel %vm905_vm5, %v3016_v47, %v902_v33  ;;  %v4851_v47 = vsub.f32 %v3557_v6, %v3932_v42  ;;  %v913_v6 = vmul.f32 %v866_v36, %v809_v2  ;;  %v4853_v2 = vsub.f32 %v3577_v10, %v3935_v16  ;;  %v4859_v36 = vld [vmem:[#allocation23_spill] sm:$0xff]  ;;  %v4163_v43 = vpop.permute.xlu1 %986 }
 0x1d5   : > { %v921_v23 = vmul.f32 %v906_v50, %v817_v15  ;;  %v922_v52 = vmul.f32 %v906_v50, %v818_v24  ;;  %v856_v15 = vsel %vm855_vm7, %v4007_v35, %v852_v53  ;;  %v975_v24 = vmul.f32 %v3883_v17, %v919_v13  ;;  %v4856_v13 = vld [vmem:[#allocation22_spill] sm:$0xff] }
 0x1d6   : > { %v915_v21 = vmul.f32 %v876_v41, %v4851_v47  ;;  %v973_v35 = vmul.f32 %v3894_v62, %v917_v49  ;;  %v911_v31 = vmul.f32 %v856_v15, %v4853_v2  ;;  %v912_v44 = vmul.f32 %v856_v15, %v4854_v56  ;;  %v4161_v49 = vpop.permute.xlu0 %981  ;;  %v4863_v47 = vld [vmem:[#allocation25_spill] sm:$0xff]  ;;  %v1563_v2 = vld [vmem:[%s4800_s6 + $0x10] sm:$0xff] }
 0x1d7   : > { %v977_v48 = vmul.f32 %v3881_v54, %v921_v23  ;;  %v978_v4 = vmul.f32 %v3881_v54, %v922_v52  ;;  %v1031_v40 = vadd.f32 %v3890_v60, %v975_v24  ;;  %v806_v10 = vsub.f32 %v3081_v9, %v3952_v29  ;;  %v4861_v23 = vld [vmem:[#allocation26_spill] sm:$0xff] }
 0x1d8   : > { %v971_v3 = vmul.f32 %v3902_v22, %v915_v21  ;;  %v969_v11 = vmul.f32 %v3908_v34, %v913_v6  ;;  %v1029_v16 = vadd.f32 %v3900_v19, %v973_v35  ;;  %v967_v20 = vmul.f32 %v3898_v18, %v911_v31  ;;  %v1561_v6 = vld [vmem:[%s4800_s6] sm:$0xff] }
 0x1d9   : > { %v1033_v7 = vadd.f32 %v3888_v59, %v977_v48  ;;  %v1034_v42 = vadd.f32 %v3888_v59, %v978_v4  ;;  %v910_v61 = vmul.f32 %v846_v0, %v806_v10  ;;  %v1028_v33 = vadd.f32 %v3906_v30, %v972_v8 }
 0x1da   : > { %v1027_v53 = vadd.f32 %v3906_v30, %v971_v3  ;;  %v968_v55 = vmul.f32 %v3898_v18, %v912_v44  ;;  %v4858_v41 = vsub.f32 %v4856_v13, %v4857_v25  ;;  %v4860_v12 = vsub.f32 %v4859_v36, %v4857_v25  ;;  %v1565_v13 = vld [vmem:[%s4800_s6 + $0x20] sm:$0xff] }
 0x1db   : > { %1487 = vmatpush.msra.mxu0 %v1033_v7  ;;  %1528 = vmatpush.msra.mxu1 %v1034_v42  ;;  %v1025_v52 = vadd.f32 %v4861_v23, %v969_v11  ;;  %v1026_v27 = vadd.f32 %v4861_v23, %v970_v26  ;;  %v1023_v28 = vadd.f32 %v4862_v46, %v967_v20  ;;  %v1564_v11 = vld [vmem:[%s4800_s6 + $0x18] sm:$0xff] }
 0x1dc   : > { %1601 = vmatpush.msrb.mxu2 %v1033_v7  ;;  %1642 = vmatpush.msrb.mxu3 %v1034_v42  ;;  %v907_v50 = vmul.f32 %v836_v39, %v4858_v41  ;;  %v908_v29 = vmul.f32 %v836_v39, %v4860_v12  ;;  %v965_v21 = vmul.f32 %v4863_v47, %v909_v63  ;;  %v1562_v7 = vld [vmem:[%s4800_s6 + $0x8] sm:$0xff] }
 0x1dd   : > { %1488 = vmatpush.msra.mxu0 %v1031_v40  ;;  %1529 = vmatpush.msra.mxu1 %v1032_v1  ;;  %v966_v32 = vmul.f32 %v4863_v47, %v910_v61  ;;  %v1024_v48 = vadd.f32 %v4862_v46, %v968_v55 }
 0x1de   : > { %1602 = vmatpush.msrb.mxu2 %v1031_v40  ;;  %1643 = vmatpush.msrb.mxu3 %v1032_v1  ;;  %v963_v57 = vmul.f32 %v4151_v14, %v907_v50  ;;  %v964_v15 = vmul.f32 %v4151_v14, %v908_v29  ;;  %v1021_v4 = vadd.f32 %v4163_v43, %v965_v21 }
 0x1df   : > { %1489 = vmatpush.msra.mxu0 %v1029_v16  ;;  %1530 = vmatpush.msra.mxu1 %v1030_v38  ;;  %v1022_v24 = vadd.f32 %v4163_v43, %v966_v32 }
 0x1e0   : > { %1603 = vmatpush.msrb.mxu2 %v1029_v16  ;;  %1644 = vmatpush.msrb.mxu3 %v1030_v38  ;;  %v1019_v5 = vadd.f32 %v4161_v49, %v963_v57  ;;  %v1020_v58 = vadd.f32 %v4161_v49, %v964_v15 }
 0x1e1   : > { %1490 = vmatpush.msra.mxu0 %v1027_v53  ;;  %1531 = vmatpush.msra.mxu1 %v1028_v33 }
 0x1e2   : > { %1604 = vmatpush.msrb.mxu2 %v1027_v53  ;;  %1645 = vmatpush.msrb.mxu3 %v1028_v33 }
 0x1e3   : > { %1491 = vmatpush.msra.mxu0 %v1025_v52  ;;  %1532 = vmatpush.msra.mxu1 %v1026_v27 }
 0x1e4   : > { %1605 = vmatpush.msrb.mxu2 %v1025_v52  ;;  %1646 = vmatpush.msrb.mxu3 %v1026_v27 }
 0x1e5   : > { %1492 = vmatpush.msra.mxu0 %v1023_v28  ;;  %1533 = vmatpush.msra.mxu1 %v1024_v48 }
 0x1e6   : > { %1606 = vmatpush.msrb.mxu2 %v1023_v28  ;;  %1647 = vmatpush.msrb.mxu3 %v1024_v48 }
 0x1e7   : > { %1493 = vmatpush.msra.mxu0 %v1021_v4  ;;  %1534 = vmatpush.msra.mxu1 %v1022_v24 }
 0x1e8   : > { %1607 = vmatpush.msrb.mxu2 %v1021_v4  ;;  %1648 = vmatpush.msrb.mxu3 %v1022_v24 }
 0x1e9   : > { %1494 = vmatpush.msra.mxu0 %v1019_v5  ;;  %1535 = vmatpush.msra.mxu1 %v1020_v58 }
 0x1ea   : > { %1608 = vmatpush.msrb.mxu2 %v1019_v5  ;;  %1649 = vmatpush.msrb.mxu3 %v1020_v58  ;;  %v1223_v37 = vpop.xlane.xlu0 %1222  ;;  %v1566_v5 = vld [vmem:[%s4800_s6 + $0x28] sm:$0xff]  ;;  %v3082_v58 = vld [vmem:[%s3516_s21 + $0x70] sm:$0xff] }
 0x1eb   : > { %2828 = vmatmul.msk.f32.vlgmr.msrb.gmra.mxu2 %vm511_vm0, %v1561_v6  ;;  %2836 = vmatmul.msk.f32.vlgmr.msrb.gmra.mxu3 %vm511_vm0, %v1561_v6  ;;  %v4201_v8 = vmul.f32 %v1223_v37, %v4864_v45  ;;  %v3083_v37 = vld [vmem:[%s3516_s21 + $0x78] sm:$0xff] }
 0x1ed   : > { %v1281_v26 = vmul.f32 %v4201_v8, %v4201_v8 }
 0x1f2   : > { %v1264_v42 = vpop.xlane.xlu0 %1263 }
 0x1f3   : > { %2829 = vmatmul.msk.f32.gmra.mxu2 %vm511_vm0, %v1562_v7  ;;  %2837 = vmatmul.msk.f32.gmra.mxu3 %vm511_vm0, %v1562_v7  ;;  %v1276_v40 = vmul.f32 %v1264_v42, %v4864_v45 }
 0x1f5   : > { %v1238_v35 = vpop.xlane.xlu2 %1237 }
 0x1f6   : > { %v4186_v3 = vmul.f32 %v1238_v35, %v4864_v45 }
 0x1f8   : > { %v1286_v31 = vmul.f32 %v4186_v3, %v4186_v3  ;;  %v1309_v6 = vsub.f32 %v3082_v58, %v4186_v3  ;;  %v1310_v7 = vsub.f32 %v3083_v37, %v4186_v3 }
 0x1fb   : > { %2830 = vmatmul.msk.f32.gmra.mxu2 %vm511_vm0, %v1563_v2  ;;  %2838 = vmatmul.msk.f32.gmra.mxu3 %vm511_vm0, %v1563_v2 }
 0x1fc   : > { %v1270_v56 = vpop.xlane.xlu0 %1269 }
 0x1fd   : > { %v1278_v44 = vmul.f32 %v1270_v56, %v4864_v45  ;;  %v1232_v0 = vpop.xlane.xlu2 %1231 }
 0x1fe   : > { %v4198_v1 = vmul.f32 %v1232_v0, %v4864_v45 }
 0x1ff   : > { %v1294_v9 = vsub.f32 %v1278_v44, %v1286_v31  ;;  %v1235_v10 = vpop.xlane.xlu1 %1234 }
 0x200   : > { %v1284_v39 = vmul.f32 %v4198_v1, %v4198_v1  ;;  %v4225_v36 = vmul.f32 %v1235_v10, %v4864_v45 }
 0x201   : > { %v1318_v16 = vadd.f32 1e-05, %v1294_v9 }
 0x202   : > { %v1292_v38 = vsub.f32 %v1276_v40, %v1284_v39  ;;  %v1285_v57 = vmul.f32 %v4225_v36, %v4225_v36 }
 0x203   : > { %3017 = vrsqrt.f32 %v1318_v16  ;;  %2831 = vmatmul.msk.f32.gmra.mxu2 %vm511_vm0, %v1564_v11  ;;  %2839 = vmatmul.msk.f32.gmra.mxu3 %vm511_vm0, %v1564_v11  ;;  %vm1395_vm11 = vweird.f32 %v1318_v16 }
 0x204   : > { %v4212_v20 = vadd.f32 1e-05, %v1292_v38  ;;  %v1255_v51 = vpop.xlane.xlu0 %1254 }
 0x205   : > { %v1273_v63 = vmul.f32 %v1255_v51, %v4864_v45  ;;  %v1229_v61 = vpop.xlane.xlu2 %1228 }
 0x206   : > { %3019 = vrsqrt.f32 %v4212_v20  ;;  %v4217_v55 = vmul.f32 %v1229_v61, %v4864_v45  ;;  %vm1375_vm14 = vweird.f32 %v4212_v20 }
 0x207   : > { %v1289_v53 = vsub.f32 %v1273_v63, %v1281_v26  ;;  %v1226_v33 = vpop.xlane.xlu1 %1225  ;;  %v1567_v63 = vld [vmem:[%s4800_s6 + $0x30] sm:$0xff] }
 0x208   : > { %v1283_v52 = vmul.f32 %v4217_v55, %v4217_v55  ;;  %v4253_v56 = vmul.f32 %v1226_v33, %v4864_v45 }
 0x209   : > { %v3018_v25 = vpop.eup %3017  ;;  %v4222_v41 = vadd.f32 1e-05, %v1289_v53 }
 0x20a   : > { %v1390_v50 = vmul.f32 %v3018_v25, %v1318_v16  ;;  %vm1396_vm12 = vweird.f32 %v3018_v25  ;;  %v1282_v16 = vmul.f32 %v4253_v56, %v4253_v56 }
 0x20b   : > { %2832 = vmatmul.msk.f32.gmra.mxu2 %vm511_vm0, %v1565_v13  ;;  %2840 = vmatmul.msk.f32.gmra.mxu3 %vm511_vm0, %v1565_v13  ;;  %3021 = vrsqrt.f32 %v4222_v41  ;;  %vm1397_vm13 = vmor %vm1395_vm11, %vm1396_vm12  ;;  %vm1345_vm7 = vweird.f32 %v4222_v41 }
 0x20c   : > { %v4229_v12 = vpop.eup %3019  ;;  %v1391_v29 = vmul.f32 %v3018_v25, %v1390_v50  ;;  %v1249_v37 = vpop.xlane.xlu0 %1248 }
 0x20d   : > { %v1370_v27 = vmul.f32 %v4229_v12, %v4212_v20  ;;  %v1261_v28 = vpop.xlane.xlu2 %1260  ;;  %vm1376_vm15 = vweird.f32 %v4229_v12  ;;  %v3086_v20 = vld [vmem:[%s3516_s21 + $0x60] sm:$0xff] }
 0x20e   : > { %v1392_v21 = vmul.f32 0.5, %v1391_v29  ;;  %v1275_v32 = vmul.f32 %v1261_v28, %v4864_v45  ;;  %vm4301_vm1 = vmor %vm1375_vm14, %vm1376_vm15 }
 0x20f   : > { %v1267_v15 = vpop.xlane.xlu1 %1266  ;;  %v1371_v42 = vmul.f32 %v4229_v12, %v1370_v27 }
 0x210   : > { %v1393_v48 = vsub.f32 1.5, %v1392_v21  ;;  %v1291_v4 = vsub.f32 %v1275_v32, %v1283_v52  ;;  %v1277_v24 = vmul.f32 %v1267_v15, %v4864_v45  ;;  %v3084_v21 = vld [vmem:[%s3516_s21 + $0x50] sm:$0xff] }
 0x211   : > { %v4250_v31 = vpop.eup %3021  ;;  %v1372_v3 = vmul.f32 0.5, %v1371_v42  ;;  %v1305_v32 = vsub.f32 %v3084_v21, %v4198_v1 }
 0x212   : > { %v1394_v35 = vmul.f32 %v3018_v25, %v1393_v48  ;;  %v4248_v2 = vadd.f32 1e-05, %v1291_v4  ;;  %v1293_v44 = vsub.f32 %v1277_v24, %v1285_v57  ;;  %v1340_v11 = vmul.f32 %v4250_v31, %v4222_v41  ;;  %v3085_v24 = vld [vmem:[%s3516_s21 + $0x58] sm:$0xff] }
 0x213   : > { %2833 = vmatmul.msk.f32.gmra.mxu2 %vm511_vm0, %v1566_v5  ;;  %2841 = vmatmul.msk.f32.gmra.mxu3 %vm511_vm0, %v1566_v5  ;;  %v1373_v61 = vsub.f32 1.5, %v1372_v3  ;;  %vm1346_vm8 = vweird.f32 %v4250_v31 }
 0x214   : > { %v1398_v0 = vsel %vm1397_vm13, %v3018_v25, %v1394_v35  ;;  %3023 = vrsqrt.f32 %v4248_v2  ;;  %v4258_v40 = vadd.f32 1e-05, %v1293_v44  ;;  %v1341_v50 = vmul.f32 %v4250_v31, %v1340_v11  ;;  %vm4364_vm10 = vmor %vm1345_vm7, %vm1346_vm8 }
 0x215   : > { %v1220_v9 = vpop.xlane.xlu2 %1219  ;;  %v1413_v10 = vmul.f32 %v1398_v0, %v1309_v6  ;;  %v1414_v39 = vmul.f32 %v1398_v0, %v1310_v7  ;;  %v1374_v57 = vmul.f32 %v4229_v12, %v1373_v61  ;;  %vm1365_vm2 = vweird.f32 %v4248_v2 }
 0x216   : > { %3025 = vrsqrt.f32 %v4258_v40  ;;  %v4267_v51 = vmul.f32 %v1220_v9, %v4864_v45  ;;  %v1342_v7 = vmul.f32 0.5, %v1341_v50  ;;  %v1307_v35 = vsub.f32 %v3086_v20, %v4225_v36  ;;  %v1568_v9 = vld [vmem:[%s4800_s6 + $0x38] sm:$0xff] }
 0x217   : > { %v1258_v38 = vpop.xlane.xlu1 %1257  ;;  %v1429_v26 = vmul.f32 %v1413_v10, %v3881_v54  ;;  %v1430_v13 = vmul.f32 %v1414_v39, %v3881_v54  ;;  %v1378_v10 = vsel %vm4301_vm1, %v4229_v12, %v1374_v57  ;;  %v3087_v39 = vld [vmem:[%s3516_s21 + $0x68] sm:$0xff]  ;;  %vm1385_vm6 = vweird.f32 %v4258_v40  ;;  %v3090_v57 = vld [vmem:[%s3516_s21 + $0x20] sm:$0xff] }
 0x218   : > { %v1274_v53 = vmul.f32 %v1258_v38, %v4864_v45  ;;  %v1280_v54 = vmul.f32 %v4267_v51, %v4267_v51  ;;  %v1308_v11 = vsub.f32 %v3087_v39, %v4225_v36  ;;  %v1271_v38 = vmul.f32 %v1249_v37, %v4864_v45  ;;  %v3093_v39 = vld [vmem:[%s3516_s21 + $0x38] sm:$0xff] }
 0x219   : > { %v1445_v33 = vadd.f32 %v1429_v26, %v3888_v59  ;;  %v1446_v27 = vadd.f32 %v1430_v13, %v3888_v59  ;;  %v1306_v59 = vsub.f32 %v3085_v24, %v4198_v1  ;;  %v1343_v12 = vsub.f32 1.5, %v1342_v7  ;;  %v3089_v13 = vld [vmem:[%s3516_s21 + $0x48] sm:$0xff] }
 0x21a   : > { %v4275_v25 = vpop.eup %3023  ;;  %v1290_v52 = vsub.f32 %v1274_v53, %v1282_v16  ;;  %v3088_v53 = vld [vmem:[%s3516_s21 + $0x40] sm:$0xff]  ;;  %v1304_v50 = vsub.f32 %v3089_v13, %v4217_v55  ;;  %v1299_v41 = vsub.f32 %v3090_v57, %v4201_v8 }
 0x21b   : > { %v1360_v29 = vmul.f32 %v4275_v25, %v4248_v2  ;;  %2834 = vmatmul.msk.f32.gmra.mxu2 %vm511_vm0, %v1567_v63  ;;  %2842 = vmatmul.msk.f32.gmra.mxu3 %vm511_vm0, %v1567_v63  ;;  %vm1366_vm3 = vweird.f32 %v4275_v25  ;;  %v1303_v36 = vsub.f32 %v3088_v53, %v4217_v55  ;;  %v1409_v2 = vmul.f32 %v1378_v10, %v1305_v32 }
 0x21c   : > { %1715 = vmatpush.msrb.mxu0 %v1445_v33  ;;  %v4287_v28 = vpop.eup %3025  ;;  %v4293_v48 = vadd.f32 1e-05, %v1290_v52  ;;  %1756 = vmatpush.msrb.mxu1 %v1446_v27  ;;  %vm4328_vm5 = vmor %vm1365_vm2, %vm1366_vm3  ;;  %v1410_v21 = vmul.f32 %v1378_v10, %v1306_v59  ;;  %v1344_v24 = vmul.f32 %v4250_v31, %v1343_v12 }
 0x21d   : > { %v1361_v15 = vmul.f32 %v4275_v25, %v1360_v29  ;;  %v1252_v4 = vpop.xlane.xlu2 %1251  ;;  %v1380_v58 = vmul.f32 %v4287_v28, %v4258_v40  ;;  %vm1386_vm4 = vweird.f32 %v4287_v28 }
 0x21e   : > { %v1272_v6 = vmul.f32 %v1252_v4, %v4864_v45  ;;  %3027 = vrsqrt.f32 %v4293_v48  ;;  %vm1387_vm9 = vmor %vm1385_vm6, %vm1386_vm4  ;;  %vm1355_vm11 = vweird.f32 %v4293_v48  ;;  %v1426_v20 = vmul.f32 %v1410_v21, %v3894_v62 }
 0x21f   : > { %v1362_v42 = vmul.f32 0.5, %v1361_v15  ;;  %v1217_v1 = vpop.xlane.xlu1 %1216  ;;  %v1381_v44 = vmul.f32 %v4287_v28, %v1380_v58  ;;  %v3091_v15 = vld [vmem:[%s3516_s21 + $0x28] sm:$0xff]  ;;  %v1425_v58 = vmul.f32 %v1409_v2, %v3894_v62  ;;  %v3094_v2 = vld [vmem:[%s3516_s21 + $0x10] sm:$0xff] }
 0x220   : > { %v1288_v0 = vsub.f32 %v1272_v6, %v1280_v54  ;;  %v4315_v3 = vmul.f32 %v1217_v1, %v4864_v45  ;;  %v1300_v4 = vsub.f32 %v3091_v15, %v4201_v8 }
 0x221   : > { %v1363_v16 = vsub.f32 1.5, %v1362_v42  ;;  %v1382_v63 = vmul.f32 0.5, %v1381_v44  ;;  %v1441_v12 = vadd.f32 %v1425_v58, %v3900_v19  ;;  %v3096_v58 = vld [vmem:[%s3516_s21] sm:$0xff] }
 0x222   : > { %v4334_v61 = vadd.f32 1e-05, %v1288_v0  ;;  %v1279_v45 = vmul.f32 %v4315_v3, %v4315_v3 }
 0x223   : > { %v1364_v33 = vmul.f32 %v4275_v25, %v1363_v16  ;;  %2835 = vmatmul.msk.f32.gmra.mxu2 %vm511_vm0, %v1568_v9  ;;  %2843 = vmatmul.msk.f32.gmra.mxu3 %vm511_vm0, %v1568_v9  ;;  %v1383_v29 = vsub.f32 1.5, %v1382_v63  ;;  %v1348_v9 = vsel %vm4364_vm10, %v4250_v31, %v1344_v24 }
 0x224   : > { %3029 = vrsqrt.f32 %v4334_v61  ;;  %v3028_v52 = vpop.eup %3027  ;;  %v1287_v27 = vsub.f32 %v1271_v38, %v1279_v45  ;;  %v1403_v53 = vmul.f32 %v1348_v9, %v1299_v41  ;;  %vm1335_vm14 = vweird.f32 %v4334_v61 }
 0x225   : > { %v1368_v54 = vsel %vm4328_vm5, %v4275_v25, %v1364_v33  ;;  %v1384_v55 = vmul.f32 %v4287_v28, %v1383_v29  ;;  %v1350_v32 = vmul.f32 %v3028_v52, %v4293_v48  ;;  %vm1356_vm12 = vweird.f32 %v3028_v52 }
 0x226   : > { %v4362_v40 = vadd.f32 1e-05, %v1287_v27  ;;  %v1407_v6 = vmul.f32 %v1368_v54, %v1303_v36  ;;  %v1408_v7 = vmul.f32 %v1368_v54, %v1304_v50  ;;  %vm4384_vm13 = vmor %vm1355_vm11, %vm1356_vm12  ;;  %v1442_v45 = vadd.f32 %v1426_v20, %v3900_v19 }
 0x227   : > { %v1351_v25 = vmul.f32 %v3028_v52, %v1350_v32  ;;  %v1388_v59 = vsel %vm1387_vm9, %v4287_v28, %v1384_v55  ;;  %v3095_v55 = vld [vmem:[%s3516_s21 + $0x18] sm:$0xff]  ;;  %v1419_v57 = vmul.f32 %v1403_v53, %v3898_v18 }
 0x228   : > { %3031 = vrsqrt.f32 %v4362_v40  ;;  %v1411_v37 = vmul.f32 %v1388_v59, %v1307_v35  ;;  %v1412_v8 = vmul.f32 %v1388_v59, %v1308_v11  ;;  %v3092_v35 = vld [vmem:[%s3516_s21 + $0x30] sm:$0xff]  ;;  %v1302_v11 = vsub.f32 %v3093_v39, %v4253_v56 }
 0x229   : > { %v1352_v1 = vmul.f32 0.5, %v1351_v25  ;;  %v1301_v10 = vsub.f32 %v3092_v35, %v4253_v56  ;;  %v1423_v16 = vmul.f32 %v1407_v6, %v3902_v22  ;;  %v1424_v31 = vmul.f32 %v1408_v7, %v3902_v22 }
 0x22a   : > { %v3030_v42 = vpop.eup %3029  ;;  %v1427_v28 = vmul.f32 %v1411_v37, %v3883_v17  ;;  %v1428_v0 = vmul.f32 %v1412_v8, %v3883_v17  ;;  %v1404_v56 = vmul.f32 %v1348_v9, %v1300_v4  ;;  %v1298_v19 = vsub.f32 %v3095_v55, %v4267_v51  ;;  %v3097_v37 = vld [vmem:[%s3516_s21 + $0x8] sm:$0xff]  ;;  %v1454_v55 = vld [vmem:[%s4799_s5 + $0x38] sm:$0xff] }
 0x22b   : > { %v1330_v44 = vmul.f32 %v3030_v42, %v4334_v61  ;;  %v1353_v48 = vsub.f32 1.5, %v1352_v1  ;;  %vm1336_vm15 = vweird.f32 %v3030_v42  ;;  %v1439_v13 = vadd.f32 %v1423_v16, %v3906_v30 }
 0x22c   : > { %v1443_v17 = vadd.f32 %v1427_v28, %v3890_v60  ;;  %v1444_v26 = vadd.f32 %v1428_v0, %v3890_v60  ;;  %v1297_v60 = vsub.f32 %v3094_v2, %v4267_v51  ;;  %v1440_v27 = vadd.f32 %v1424_v31, %v3906_v30  ;;  %vm1337_vm1 = vmor %vm1335_vm14, %vm1336_vm15 }
 0x22d   : > { %v1331_v38 = vmul.f32 %v3030_v42, %v1330_v44  ;;  %v1354_v63 = vmul.f32 %v3028_v52, %v1353_v48  ;;  %v1420_v41 = vmul.f32 %v1404_v56, %v3898_v18  ;;  %vm1325_vm2 = vweird.f32 %v4362_v40 }
 0x22e   : > { %v3032_v36 = vpop.eup %3031  ;;  %1716 = vmatpush.msrb.mxu0 %v1443_v17  ;;  %1757 = vmatpush.msrb.mxu1 %v1444_v26  ;;  %v1435_v18 = vadd.f32 %v1419_v57, %v4862_v46  ;;  %v1295_v6 = vsub.f32 %v3096_v58, %v4315_v3  ;;  %v1447_v17 = vld [vmem:[%s4799_s5] sm:$0xff] }
 0x22f   : > { %v1332_v33 = vmul.f32 0.5, %v1331_v38  ;;  %v1320_v22 = vmul.f32 %v3032_v36, %v4362_v40  ;;  %v1358_v50 = vsel %vm4384_vm13, %v3028_v52, %v1354_v63  ;;  %vm1326_vm3 = vweird.f32 %v3032_v36  ;;  %2812 = vmatmul.msk.f32.vlgmr.msra.gmra.mxu0 %vm511_vm0, %v1447_v17  ;;  %2820 = vmatmul.msk.f32.vlgmr.msra.gmra.mxu1 %vm511_vm0, %v1447_v17 }
 0x230   : > { %1717 = vmatpush.msrb.mxu0 %v1441_v12  ;;  %1758 = vmatpush.msrb.mxu1 %v1442_v45  ;;  %v1405_v54 = vmul.f32 %v1358_v50, %v1301_v10  ;;  %v1406_v21 = vmul.f32 %v1358_v50, %v1302_v11  ;;  %vm1327_vm5 = vmor %vm1325_vm2, %vm1326_vm3  ;;  %v1436_v40 = vadd.f32 %v1420_v41, %v4862_v46  ;;  %v1448_v12 = vld [vmem:[%s4799_s5 + $0x8] sm:$0xff] }
 0x231   : > { %v1333_v29 = vsub.f32 1.5, %v1332_v33  ;;  %v1321_v32 = vmul.f32 %v3032_v36, %v1320_v22  ;;  %v1449_v33 = vld [vmem:[%s4799_s5 + $0x10] sm:$0xff]  ;;  %v1450_v22 = vld [vmem:[%s4799_s5 + $0x18] sm:$0xff] }
 0x232   : > { %1718 = vmatpush.msrb.mxu0 %v1439_v13  ;;  %1759 = vmatpush.msrb.mxu1 %v1440_v27  ;;  %v1421_v30 = vmul.f32 %v1405_v54, %v3908_v34  ;;  %v1422_v15 = vmul.f32 %v1406_v21, %v3908_v34  ;;  %v1296_v34 = vsub.f32 %v3097_v37, %v4315_v3  ;;  %v1451_v27 = vld [vmem:[%s4799_s5 + $0x20] sm:$0xff]  ;;  %v1452_v54 = vld [vmem:[%s4799_s5 + $0x28] sm:$0xff]  ;;  %v1453_v21 = vld [vmem:[%s4799_s5 + $0x30] sm:$0xff] }
 0x233   : > { %v1334_v52 = vmul.f32 %v3030_v42, %v1333_v29  ;;  %v1322_v4 = vmul.f32 0.5, %v1321_v32 }
 0x234   : > { %v1437_v51 = vadd.f32 %v1421_v30, %v4861_v23  ;;  %v1438_v61 = vadd.f32 %v1422_v15, %v4861_v23  ;;  %v1675_v30 = vld [vmem:[#allocation7] sm:$0xff] }
 0x235   : > { %v1338_v24 = vsel %vm1337_vm1, %v3030_v42, %v1334_v52  ;;  %v1323_v5 = vsub.f32 1.5, %v1322_v4 }
 0x236   : > { %v1401_v25 = vmul.f32 %v1338_v24, %v1297_v60  ;;  %v1402_v59 = vmul.f32 %v1338_v24, %v1298_v19  ;;  %1719 = vmatpush.msrb.mxu0 %v1437_v51  ;;  %1760 = vmatpush.msrb.mxu1 %v1438_v61 }
 0x237   : > { %v1324_v8 = vmul.f32 %v3032_v36, %v1323_v5  ;;  %2813 = vmatmul.msk.f32.gmra.mxu0 %vm511_vm0, %v1448_v12  ;;  %2821 = vmatmul.msk.f32.gmra.mxu1 %vm511_vm0, %v1448_v12 }
 0x238   : > { %v1417_v23 = vmul.f32 %v1401_v25, %v4863_v47  ;;  %v1418_v7 = vmul.f32 %v1402_v59, %v4863_v47  ;;  %1720 = vmatpush.msrb.mxu0 %v1435_v18  ;;  %1761 = vmatpush.msrb.mxu1 %v1436_v40  ;;  %v1676_v59 = vld [vmem:[#allocation7 + $0x8] sm:$0xff] }
 0x239   : > { %v1328_v20 = vsel %vm1327_vm5, %v3032_v36, %v1324_v8 }
 0x23a   : > { %v1433_v42 = vadd.f32 %v1417_v23, %v4163_v43  ;;  %v1434_v1 = vadd.f32 %v1418_v7, %v4163_v43  ;;  %v1399_v44 = vmul.f32 %v1328_v20, %v1295_v6  ;;  %v1400_v28 = vmul.f32 %v1328_v20, %v1296_v34 }
 0x23c   : > { %1721 = vmatpush.msrb.mxu0 %v1433_v42  ;;  %1762 = vmatpush.msrb.mxu1 %v1434_v1  ;;  %v1415_v3 = vmul.f32 %v1399_v44, %v4151_v14  ;;  %v1416_v46 = vmul.f32 %v1400_v28, %v4151_v14  ;;  %v1677_v42 = vld [vmem:[#allocation7 + $0x10] sm:$0xff] }
 0x23e   : > { %v1431_v0 = vadd.f32 %v1415_v3, %v4161_v49  ;;  %v1432_v9 = vadd.f32 %v1416_v46, %v4161_v49 }
 0x23f   : > { %2814 = vmatmul.msk.f32.gmra.mxu0 %vm511_vm0, %v1449_v33  ;;  %2822 = vmatmul.msk.f32.gmra.mxu1 %vm511_vm0, %v1449_v33  ;;  %v1680_v33 = vld [vmem:[#allocation7 + $0x28] sm:$0xff] }
 0x240   : > { %1722 = vmatpush.msrb.mxu0 %v1431_v0  ;;  %1763 = vmatpush.msrb.mxu1 %v1432_v9 }
 0x247   : > { %2815 = vmatmul.msk.f32.gmra.mxu0 %vm511_vm0, %v1450_v22  ;;  %2823 = vmatmul.msk.f32.gmra.mxu1 %vm511_vm0, %v1450_v22 }
 0x24f   : > { %2816 = vmatmul.msk.f32.gmra.mxu0 %vm511_vm0, %v1451_v27  ;;  %2824 = vmatmul.msk.f32.gmra.mxu1 %vm511_vm0, %v1451_v27 }
 0x257   : > { %2825 = vmatmul.msk.f32.gmra.mxu1 %vm511_vm0, %v1452_v54  ;;  %2817 = vmatmul.msk.f32.gmra.mxu0 %vm511_vm0, %v1452_v54 }
 0x25f   : > { %2818 = vmatmul.msk.f32.gmra.mxu0 %vm511_vm0, %v1453_v21  ;;  %2826 = vmatmul.msk.f32.gmra.mxu1 %vm511_vm0, %v1453_v21 }
 0x267   : > { %2819 = vmatmul.msk.f32.gmra.mxu0 %vm511_vm0, %v1454_v55  ;;  %2827 = vmatmul.msk.f32.gmra.mxu1 %vm511_vm0, %v1454_v55  ;;  %v1681_v55 = vld [vmem:[#allocation7 + $0x30] sm:$0xff] }
 0x26e   : > { %v1610_v47 = vpop.f32.mrf.mxu2  ;;  %v1651_v35 = vpop.f32.mrf.mxu3 }
 0x26f   : > { %v1789_v10 = vmax.f32 %v1610_v47, %v1651_v35  ;;  %2844 = vmatmul.msk.f32.vlgmr.msrb.gmra.mxu0 %vm511_vm0, %v1675_v30  ;;  %2852 = vmatmul.msk.f32.vlgmr.msrb.gmra.mxu1 %vm511_vm0, %v1675_v30 }
 0x271   : > { %1790 = vmax.xlane.f32.xlu2 %v1789_v10 }
 0x276   : > { %v4427_v43 = vpop.f32.mrf.mxu2  ;;  %v4429_v39 = vpop.f32.mrf.mxu3 }
 0x277   : > { %v1792_v11 = vmax.f32 %v4427_v43, %v4429_v39  ;;  %2845 = vmatmul.msk.f32.gmra.mxu0 %vm511_vm0, %v1676_v59  ;;  %2853 = vmatmul.msk.f32.gmra.mxu1 %vm511_vm0, %v1676_v59 }
 0x279   : > { %1793 = vmax.xlane.f32.xlu1 %v1792_v11 }
 0x27e   : > { %v4433_v48 = vpop.f32.mrf.mxu2  ;;  %v4435_v14 = vpop.f32.mrf.mxu3 }
 0x27f   : > { %v1795_v49 = vmax.f32 %v4433_v48, %v4435_v14  ;;  %2846 = vmatmul.msk.f32.gmra.mxu0 %vm511_vm0, %v1677_v42  ;;  %2854 = vmatmul.msk.f32.gmra.mxu1 %vm511_vm0, %v1677_v42  ;;  %v2416_v42 = vld [vmem:[%s4803_s9 + $0x10] sm:$0xff] }
 0x281   : > { %1796 = vmax.xlane.f32.xlu1 %v1795_v49 }
 0x286   : > { %v4439_v16 = vpop.f32.mrf.mxu2  ;;  %v4441_v62 = vpop.f32.mrf.mxu3 }
 0x287   : > { %v1798_v38 = vmax.f32 %v4439_v16, %v4441_v62 }
 0x289   : > { %1799 = vmax.xlane.f32.xlu0 %v1798_v38 }
 0x28e   : > { %v4450_v26 = vpop.f32.mrf.mxu2  ;;  %v4452_v31 = vpop.f32.mrf.mxu3 }
 0x28f   : > { %v1801_v63 = vmax.f32 %v4450_v26, %v4452_v31 }
 0x291   : > { %1802 = vmax.xlane.f32.xlu0 %v1801_v63 }
 0x296   : > { %v4461_v53 = vpop.f32.mrf.mxu2  ;;  %v4463_v56 = vpop.f32.mrf.mxu3 }
 0x297   : > { %v1804_v36 = vmax.f32 %v4461_v53, %v4463_v56 }
 0x299   : > { %1805 = vmax.xlane.f32.xlu2 %v1804_v36 }
 0x29e   : > { %v4472_v45 = vpop.f32.mrf.mxu2  ;;  %v4474_v2 = vpop.f32.mrf.mxu3 }
 0x29f   : > { %v1807_v60 = vmax.f32 %v4472_v45, %v4474_v2 }
 0x2a1   : > { %1808 = vmax.xlane.f32.xlu2 %v1807_v60 }
 0x2a6   : > { %v4483_v13 = vpop.f32.mrf.mxu2  ;;  %v4485_v50 = vpop.f32.mrf.mxu3 }
 0x2a7   : > { %v1810_v29 = vmax.f32 %v4483_v13, %v4485_v50 }
 0x2a9   : > { %1811 = vmax.xlane.f32.xlu1 %v1810_v29 }
 0x2e4   : > { %v1791_v19 = vpop.xlane.xlu2 %1790 }
 0x2e5   : > { %v1813_v32 = vsub.f32 %v1610_v47, %v1791_v19  ;;  %v1814_v57 = vsub.f32 %v1651_v35, %v1791_v19  ;;  %v1678_v47 = vld [vmem:[#allocation7 + $0x18] sm:$0xff] }
 0x2e6   : > { %2847 = vmatmul.msk.f32.gmra.mxu0 %vm511_vm0, %v1678_v47  ;;  %2855 = vmatmul.msk.f32.gmra.mxu1 %vm511_vm0, %v1678_v47 }
 0x2e7   : > { %v1829_v41 = vmul.f32 1.442695, %v1813_v32  ;;  %v1831_v52 = vmul.f32 1.442695, %v1814_v57  ;;  %v1496_v32 = vpop.f32.mrf.mxu0  ;;  %v1537_v57 = vpop.f32.mrf.mxu1 }
 0x2e9   : > { %3033 = vpow2.f32 %v1829_v41 }
 0x2ea   : > { %3035 = vpow2.f32 %v1831_v52 }
 0x2ec   : > { %v1794_v15 = vpop.xlane.xlu1 %1793 }
 0x2ed   : > { %v1815_v4 = vsub.f32 %v4427_v43, %v1794_v15  ;;  %v1816_v51 = vsub.f32 %v4429_v39, %v1794_v15 }
 0x2ef   : > { %v4513_v61 = vpop.eup %3033  ;;  %v1833_v24 = vmul.f32 1.442695, %v1815_v4  ;;  %v1835_v5 = vmul.f32 1.442695, %v1816_v51  ;;  %v1682_v4 = vld [vmem:[#allocation7 + $0x38] sm:$0xff] }
 0x2f0   : > { %v4515_v18 = vpop.eup %3035 }
 0x2f1   : > { %3037 = vpow2.f32 %v1833_v24  ;;  %v1861_v25 = vadd.f32 %v4515_v18, %v4513_v61 }
 0x2f2   : > { %3039 = vpow2.f32 %v1835_v5 }
 0x2f3   : > { %1862 = vadd.xlane.f32.xlu1 %v1861_v25  ;;  %v2414_v25 = vld [vmem:[%s4803_s9] sm:$0xff] }
 0x2f4   : > { %v1797_v58 = vpop.xlane.xlu1 %1796 }
 0x2f5   : > { %v1817_v6 = vsub.f32 %v4433_v48, %v1797_v58  ;;  %v1818_v37 = vsub.f32 %v4435_v14, %v1797_v58 }
 0x2f7   : > { %v4523_v34 = vpop.eup %3037  ;;  %v1837_v40 = vmul.f32 1.442695, %v1817_v6  ;;  %v1839_v8 = vmul.f32 1.442695, %v1818_v37  ;;  %v2418_v37 = vld [vmem:[%s4803_s9 + $0x20] sm:$0xff] }
 0x2f8   : > { %v4525_v23 = vpop.eup %3039 }
 0x2f9   : > { %3041 = vpow2.f32 %v1837_v40  ;;  %v1864_v7 = vadd.f32 %v4525_v23, %v4523_v34 }
 0x2fa   : > { %3043 = vpow2.f32 %v1839_v8 }
 0x2fb   : > { %1865 = vadd.xlane.f32.xlu0 %v1864_v7  ;;  %v2421_v7 = vld [vmem:[%s4803_s9 + $0x38] sm:$0xff] }
 0x2fc   : > { %v1800_v1 = vpop.xlane.xlu0 %1799 }
 0x2fd   : > { %v1819_v20 = vsub.f32 %v4439_v16, %v1800_v1  ;;  %v1820_v44 = vsub.f32 %v4441_v62, %v1800_v1  ;;  %v1679_v16 = vld [vmem:[#allocation7 + $0x20] sm:$0xff]  ;;  %v2415_v1 = vld [vmem:[%s4803_s9 + $0x8] sm:$0xff] }
 0x2fe   : > { %2848 = vmatmul.msk.f32.gmra.mxu0 %vm511_vm0, %v1679_v16  ;;  %2856 = vmatmul.msk.f32.gmra.mxu1 %vm511_vm0, %v1679_v16 }
 0x2ff   : > { %v4533_v28 = vpop.eup %3041  ;;  %v1841_v3 = vmul.f32 1.442695, %v1819_v20  ;;  %v1843_v46 = vmul.f32 1.442695, %v1820_v44 }
 0x300   : > { %v4535_v0 = vpop.eup %3043 }
 0x301   : > { %3045 = vpow2.f32 %v1841_v3  ;;  %v1867_v9 = vadd.f32 %v4535_v0, %v4533_v28  ;;  %v2419_v3 = vld [vmem:[%s4803_s9 + $0x28] sm:$0xff] }
 0x302   : > { %3047 = vpow2.f32 %v1843_v46  ;;  %v2417_v46 = vld [vmem:[%s4803_s9 + $0x18] sm:$0xff] }
 0x303   : > { %1868 = vadd.xlane.f32.xlu0 %v1867_v9 }
 0x304   : > { %v1803_v35 = vpop.xlane.xlu0 %1802 }
 0x305   : > { %v1821_v10 = vsub.f32 %v4450_v26, %v1803_v35  ;;  %v1822_v43 = vsub.f32 %v4452_v31, %v1803_v35  ;;  %v2420_v35 = vld [vmem:[%s4803_s9 + $0x30] sm:$0xff] }
 0x306   : > { %2849 = vmatmul.msk.f32.gmra.mxu0 %vm511_vm0, %v1680_v33  ;;  %2857 = vmatmul.msk.f32.gmra.mxu1 %vm511_vm0, %v1680_v33 }
 0x307   : > { %v4543_v39 = vpop.eup %3045  ;;  %v1845_v11 = vmul.f32 1.442695, %v1821_v10  ;;  %v1847_v48 = vmul.f32 1.442695, %v1822_v43 }
 0x308   : > { %v4545_v14 = vpop.eup %3047 }
 0x309   : > { %3049 = vpow2.f32 %v1845_v11  ;;  %v1870_v49 = vadd.f32 %v4545_v14, %v4543_v39 }
 0x30a   : > { %3051 = vpow2.f32 %v1847_v48 }
 0x30b   : > { %1871 = vadd.xlane.f32.xlu2 %v1870_v49 }
 0x30c   : > { %v1806_v62 = vpop.xlane.xlu2 %1805 }
 0x30d   : > { %v1823_v38 = vsub.f32 %v4461_v53, %v1806_v62  ;;  %v1824_v17 = vsub.f32 %v4463_v56, %v1806_v62 }
 0x30e   : > { %2850 = vmatmul.msk.f32.gmra.mxu0 %vm511_vm0, %v1681_v55  ;;  %2858 = vmatmul.msk.f32.gmra.mxu1 %vm511_vm0, %v1681_v55 }
 0x30f   : > { %v4553_v26 = vpop.eup %3049  ;;  %v1849_v31 = vmul.f32 1.442695, %v1823_v38  ;;  %v1851_v63 = vmul.f32 1.442695, %v1824_v17 }
 0x310   : > { %v4555_v12 = vpop.eup %3051 }
 0x311   : > { %3053 = vpow2.f32 %v1849_v31  ;;  %v1873_v36 = vadd.f32 %v4555_v12, %v4553_v26 }
 0x312   : > { %3055 = vpow2.f32 %v1851_v63 }
 0x313   : > { %1874 = vadd.xlane.f32.xlu2 %v1873_v36 }
 0x314   : > { %v1809_v60 = vpop.xlane.xlu2 %1808 }
 0x315   : > { %v1825_v53 = vsub.f32 %v4472_v45, %v1809_v60  ;;  %v1826_v56 = vsub.f32 %v4474_v2, %v1809_v60 }
 0x316   : > { %2851 = vmatmul.msk.f32.gmra.mxu0 %vm511_vm0, %v1682_v4  ;;  %2859 = vmatmul.msk.f32.gmra.mxu1 %vm511_vm0, %v1682_v4 }
 0x317   : > { %v4563_v22 = vpop.eup %3053  ;;  %v1853_v29 = vmul.f32 1.442695, %v1825_v53  ;;  %v1855_v27 = vmul.f32 1.442695, %v1826_v56 }
 0x318   : > { %v4565_v54 = vpop.eup %3055 }
 0x319   : > { %3057 = vpow2.f32 %v1853_v29  ;;  %v1876_v21 = vadd.f32 %v4565_v54, %v4563_v22 }
 0x31a   : > { %3059 = vpow2.f32 %v1855_v27 }
 0x31b   : > { %1877 = vadd.xlane.f32.xlu1 %v1876_v21 }
 0x31c   : > { %v1812_v19 = vpop.xlane.xlu1 %1811 }
 0x31d   : > { %v1827_v45 = vsub.f32 %v4483_v13, %v1812_v19  ;;  %v1828_v2 = vsub.f32 %v4485_v50, %v1812_v19  ;;  %v1499_v13 = vpop.f32.mrf.mxu0  ;;  %v1540_v50 = vpop.f32.mrf.mxu1 }
 0x31e   : > { %2218 = vmatpush.msra.mxu0 %v1499_v13  ;;  %2241 = vmatpush.msra.mxu1 %v1540_v50 }
 0x31f   : > { %v4573_v41 = vpop.eup %3057  ;;  %v1857_v52 = vmul.f32 1.442695, %v1827_v45  ;;  %v1859_v30 = vmul.f32 1.442695, %v1828_v2 }
 0x320   : > { %v4575_v15 = vpop.eup %3059  ;;  %2219 = vmatpush.msra.mxu0 %v1496_v32  ;;  %2242 = vmatpush.msra.mxu1 %v1537_v57 }
 0x321   : > { %3061 = vpow2.f32 %v1857_v52  ;;  %v1879_v51 = vadd.f32 %v4575_v15, %v4573_v41 }
 0x322   : > { %3063 = vpow2.f32 %v1859_v30 }
 0x323   : > { %1880 = vadd.xlane.f32.xlu1 %v1879_v51 }
 0x325   : > { %v4590_v58 = vpop.f32.mrf.mxu0  ;;  %v4592_v6 = vpop.f32.mrf.mxu1 }
 0x327   : > { %v4581_v24 = vpop.eup %3061 }
 0x328   : > { %v4583_v5 = vpop.eup %3063 }
 0x329   : > { %v1882_v59 = vadd.f32 %v4583_v5, %v4581_v24 }
 0x32b   : > { %2424 = vperm.xlu2 %2997, %v2414_v25   ;;  %1883 = vadd.xlane.f32.xlu0 %v1882_v59 }
 0x32d   : > { %v4597_v40 = vpop.f32.mrf.mxu0  ;;  %v4599_v8 = vpop.f32.mrf.mxu1 }
 0x333   : > { %2444 = vperm.xlu2 %2997, %v2418_v37  }
 0x335   : > { %v1508_v20 = vpop.f32.mrf.mxu0  ;;  %v1549_v44 = vpop.f32.mrf.mxu1 }
 0x33b   : > { %2459 = vperm.xlu2 %2997, %v2421_v7  }
 0x33c   : > { %2434 = vperm.xlu1 %2996, %v2416_v42  }
 0x33d   : > { %v1511_v9 = vpop.f32.mrf.mxu0  ;;  %v1552_v47 = vpop.f32.mrf.mxu1 }
 0x33e   : > { %2322 = vmatpush.msrb.mxu0 %v1511_v9  ;;  %2345 = vmatpush.msrb.mxu1 %v1552_v47 }
 0x33f   : > { %2429 = vperm.xlu0 %2998, %v2415_v1  }
 0x340   : > { %2323 = vmatpush.msrb.mxu0 %v1508_v20  ;;  %2346 = vmatpush.msrb.mxu1 %v1549_v44 }
 0x344   : > { %2449 = vperm.xlu1 %2996, %v2419_v3  }
 0x345   : > { %v4619_v10 = vpop.f32.mrf.mxu0  ;;  %v4621_v43 = vpop.f32.mrf.mxu1 }
 0x347   : > { %2439 = vperm.xlu0 %2998, %v2417_v46  }
 0x34d   : > { %v4623_v62 = vpop.f32.mrf.mxu0  ;;  %v4625_v38 = vpop.f32.mrf.mxu1 }
 0x34f   : > { %2454 = vperm.xlu0 %2998, %v2420_v35  }
 0x355   : > { %v1724_v53 = vpop.f32.mrf.mxu0  ;;  %v1765_v56 = vpop.f32.mrf.mxu1 }
 0x35d   : > { %v1727_v42 = vpop.f32.mrf.mxu0  ;;  %v1768_v1 = vpop.f32.mrf.mxu1 }
 0x366   : > { %v1863_v11 = vpop.xlane.xlu1 %1862 }
 0x367   : > { %3065 = vrcp.f32 %v1863_v11  ;;  %v1896_v19 = vand.u32 2147483648, %v1863_v11  ;;  %vm1890_vm8 = vweird.f32 %v1863_v11  ;;  %v1894_v32 = vand.u32 2147483647, %v1863_v11 }
 0x369   : > { %v1897_v13 = vor.u32 1.1754944e-38, %v1896_v19  ;;  %vm1895_vm12 = vcmp.eq.f32.partialorder %v1894_v32, 8.507059e+37 }
 0x36d   : > { %v3066_v48 = vpop.eup %3065 }
 0x36e   : > { %v1866_v49 = vpop.xlane.xlu0 %1865  ;;  %v1886_v16 = vmul.f32 %v3066_v48, %v1863_v11  ;;  %vm1891_vm4 = vweird.f32 %v3066_v48 }
 0x36f   : > { %3067 = vrcp.f32 %v1866_v49  ;;  %v1912_v27 = vand.u32 2147483648, %v1866_v49  ;;  %v1910_v21 = vand.u32 2147483647, %v1866_v49  ;;  %vm1906_vm7 = vweird.f32 %v1866_v49  ;;  %vm1892_vm10 = vmor %vm1890_vm8, %vm1891_vm4 }
 0x370   : > { %v1887_v17 = vsub.f32 1.0, %v1886_v16 }
 0x371   : > { %v1913_v57 = vor.u32 1.1754944e-38, %v1912_v27  ;;  %vm1911_vm11 = vcmp.eq.f32.partialorder %v1910_v21, 8.507059e+37 }
 0x372   : > { %v1888_v33 = vmul.f32 %v3066_v48, %v1887_v17  ;;  %v1730_v17 = vpop.f32.mrf.mxu0 }
 0x374   : > { %v1889_v55 = vadd.f32 %v3066_v48, %v1888_v33 }
 0x375   : > { %v3068_v31 = vpop.eup %3067 }
 0x376   : > { %v1902_v63 = vmul.f32 %v3068_v31, %v1866_v49  ;;  %v4627_v36 = vpop.xlane.xlu0 %1868  ;;  %vm1907_vm6 = vweird.f32 %v3068_v31  ;;  %v1893_v51 = vsel %vm1892_vm10, %v3066_v48, %v1889_v55 }
 0x377   : > { %3069 = vrcp.f32 %v4627_v36  ;;  %vm1908_vm9 = vmor %vm1906_vm7, %vm1907_vm6  ;;  %v1898_v37 = vsel %vm1895_vm12, %v1897_v13, %v1893_v51  ;;  %vm1922_vm1 = vweird.f32 %v4627_v36  ;;  %v1926_v16 = vand.u32 2147483647, %v4627_v36 }
 0x378   : > { %v1903_v60 = vsub.f32 1.0, %v1902_v63  ;;  %v1899_v44 = vmul.f32 %v4513_v61, %v1898_v37  ;;  %v1900_v3 = vmul.f32 %v4515_v18, %v1898_v37  ;;  %v1928_v18 = vand.u32 2147483648, %v4627_v36 }
 0x379   : > { %vm1927_vm6 = vcmp.eq.f32.partialorder %v1926_v16, 8.507059e+37 }
 0x37a   : > { %v1904_v29 = vmul.f32 %v3068_v31, %v1903_v60 }
 0x37c   : > { %v1905_v45 = vadd.f32 %v3068_v31, %v1904_v29  ;;  %v1929_v29 = vor.u32 1.1754944e-38, %v1928_v18 }
 0x37d   : > { %v4630_v2 = vpop.eup %3069 }
 0x37e   : > { %v1872_v52 = vpop.xlane.xlu2 %1871  ;;  %v1909_v30 = vsel %vm1908_vm9, %v3068_v31, %v1905_v45  ;;  %v1918_v4 = vmul.f32 %v4630_v2, %v4627_v36  ;;  %vm1923_vm14 = vweird.f32 %v4630_v2  ;;  %v1771_v31 = vpop.f32.mrf.mxu1 }
 0x37f   : > { %3071 = vrcp.f32 %v1872_v52  ;;  %v1914_v50 = vsel %vm1911_vm11, %v1913_v57, %v1909_v30  ;;  %v1944_v35 = vand.u32 2147483648, %v1872_v52  ;;  %v1942_v11 = vand.u32 2147483647, %v1872_v52  ;;  %vm1924_vm3 = vmor %vm1922_vm1, %vm1923_vm14 }
 0x380   : > { %v1915_v25 = vmul.f32 %v4523_v34, %v1914_v50  ;;  %v1916_v59 = vmul.f32 %v4525_v23, %v1914_v50  ;;  %v1919_v7 = vsub.f32 1.0, %v1918_v4  ;;  %vm1938_vm15 = vweird.f32 %v1872_v52 }
 0x381   : > { %v1945_v63 = vor.u32 1.1754944e-38, %v1944_v35  ;;  %vm1943_vm5 = vcmp.eq.f32.partialorder %v1942_v11, 8.507059e+37 }
 0x382   : > { %2027 = vmatpush.xpose.msra.mxu2 %v1915_v25  ;;  %2050 = vmatpush.xpose.msra.mxu3 %v1916_v59  ;;  %v1920_v47 = vmul.f32 %v4630_v2, %v1919_v7 }
 0x384   : > { %v1921_v61 = vadd.f32 %v4630_v2, %v1920_v47 }
 0x385   : > { %v3072_v20 = vpop.eup %3071 }
 0x386   : > { %v1934_v46 = vmul.f32 %v3072_v20, %v1872_v52  ;;  %v4638_v9 = vpop.xlane.xlu2 %1874  ;;  %2028 = vmatpush.xpose.msra.mxu2 %v1899_v44  ;;  %2051 = vmatpush.xpose.msra.mxu3 %v1900_v3  ;;  %vm1939_vm13 = vweird.f32 %v3072_v20 }
 0x387   : > { %3073 = vrcp.f32 %v4638_v9  ;;  %vm1940_vm2 = vmor %vm1938_vm15, %vm1939_vm13  ;;  %v1960_v50 = vand.u32 2147483648, %v4638_v9  ;;  %vm1954_vm9 = vweird.f32 %v4638_v9  ;;  %v1958_v37 = vand.u32 2147483647, %v4638_v9 }
 0x388   : > { %v1935_v34 = vsub.f32 1.0, %v1934_v46 }
 0x389   : > { %2029 = vmatmul.f32.vlgmr.msra.gmra.mxu2 %v1724_v53  ;;  %2052 = vmatmul.f32.vlgmr.msra.gmra.mxu3 %v1765_v56  ;;  %v1925_v56 = vsel %vm1924_vm3, %v4630_v2, %v1921_v61  ;;  %v1961_v3 = vor.u32 1.1754944e-38, %v1960_v50  ;;  %vm1959_vm13 = vcmp.eq.f32.partialorder %v1958_v37, 8.507059e+37 }
 0x38a   : > { %v1936_v23 = vmul.f32 %v3072_v20, %v1935_v34  ;;  %v1930_v36 = vsel %vm1927_vm6, %v1929_v29, %v1925_v56 }
 0x38b   : > { %v1931_v32 = vmul.f32 %v4533_v28, %v1930_v36  ;;  %v1932_v57 = vmul.f32 %v4535_v0, %v1930_v36 }
 0x38c   : > { %v1937_v48 = vadd.f32 %v3072_v20, %v1936_v23 }
 0x38d   : > { %v4645_v49 = vpop.eup %3073 }
 0x38e   : > { %v1878_v33 = vpop.xlane.xlu1 %1877  ;;  %v1941_v60 = vsel %vm1940_vm2, %v3072_v20, %v1937_v48  ;;  %v1950_v53 = vmul.f32 %v4645_v49, %v4638_v9  ;;  %vm1955_vm7 = vweird.f32 %v4645_v49 }
 0x38f   : > { %3075 = vrcp.f32 %v1878_v33  ;;  %v1946_v27 = vsel %vm1943_vm5, %v1945_v63, %v1941_v60  ;;  %v1976_v13 = vand.u32 2147483648, %v1878_v33  ;;  %v1974_v28 = vand.u32 2147483647, %v1878_v33  ;;  %vm1956_vm11 = vmor %vm1954_vm9, %vm1955_vm7 }
 0x390   : > { %v1947_v21 = vmul.f32 %v4543_v39, %v1946_v27  ;;  %v1948_v55 = vmul.f32 %v4545_v14, %v1946_v27  ;;  %v1951_v19 = vsub.f32 1.0, %v1950_v53  ;;  %v1733_v39 = vpop.f32.mrf.mxu0  ;;  %v1774_v14 = vpop.f32.mrf.mxu1  ;;  %vm1970_vm8 = vweird.f32 %v1878_v33 }
 0x391   : > { %2032 = vmatmul.f32.gmra.mxu2 %v1727_v42  ;;  %2055 = vmatmul.f32.gmra.mxu3 %v1768_v1  ;;  %v1977_v7 = vor.u32 1.1754944e-38, %v1976_v13  ;;  %vm1975_vm12 = vcmp.eq.f32.partialorder %v1974_v28, 8.507059e+37  ;;  %vm2197_vm7 = vcmask 130048  }
 0x392   : > { %2073 = vmatpush.xpose.msrb.mxu2 %v1947_v21  ;;  %2096 = vmatpush.xpose.msrb.mxu3 %v1948_v55  ;;  %v1952_v30 = vmul.f32 %v4645_v49, %v1951_v19 }
 0x394   : > { %v1953_v0 = vadd.f32 %v4645_v49, %v1952_v30 }
 0x395   : > { %v3076_v45 = vpop.eup %3075 }
 0x396   : > { %v1966_v52 = vmul.f32 %v3076_v45, %v1878_v33  ;;  %v4656_v2 = vpop.xlane.xlu1 %1880  ;;  %2074 = vmatpush.xpose.msrb.mxu2 %v1931_v32  ;;  %2097 = vmatpush.xpose.msrb.mxu3 %v1932_v57  ;;  %vm1971_vm4 = vweird.f32 %v3076_v45  ;;  %v1957_v44 = vsel %vm1956_vm11, %v4645_v49, %v1953_v0 }
 0x397   : > { %3077 = vrcp.f32 %v4656_v2  ;;  %vm1972_vm10 = vmor %vm1970_vm8, %vm1971_vm4  ;;  %v1962_v35 = vsel %vm1959_vm13, %v1961_v3, %v1957_v44  ;;  %vm1986_vm2 = vweird.f32 %v4656_v2  ;;  %v1990_v56 = vand.u32 2147483647, %v4656_v2 }
 0x398   : > { %v1967_v4 = vsub.f32 1.0, %v1966_v52  ;;  %v1736_v23 = vpop.f32.mrf.mxu0  ;;  %v1777_v9 = vpop.f32.mrf.mxu1  ;;  %v1963_v18 = vmul.f32 %v4553_v26, %v1962_v35  ;;  %v1964_v48 = vmul.f32 %v4555_v12, %v1962_v35  ;;  %v1992_v26 = vand.u32 2147483648, %v4656_v2 }
 0x399   : > { %2075 = vmatmul.f32.vlgmr.msrb.gmra.mxu2 %v1730_v17  ;;  %2098 = vmatmul.f32.vlgmr.msrb.gmra.mxu3 %v1771_v31  ;;  %vm1991_vm4 = vcmp.eq.f32.partialorder %v1990_v56, 8.507059e+37 }
 0x39a   : > { %v1968_v51 = vmul.f32 %v3076_v45, %v1967_v4  ;;  %v1993_v55 = vor.u32 1.1754944e-38, %v1992_v26  ;;  %v2413_v26 = vld [vmem:[#allocation8 + $0x38] sm:$0xff] }
 0x39c   : > { %v1969_v25 = vadd.f32 %v3076_v45, %v1968_v51 }
 0x39d   : > { %v4663_v59 = vpop.eup %3077 }
 0x39e   : > { %v1884_v42 = vpop.xlane.xlu0 %1883  ;;  %v1973_v1 = vsel %vm1972_vm10, %v3076_v45, %v1969_v25  ;;  %v1982_v20 = vmul.f32 %v4663_v59, %v4656_v2  ;;  %vm1987_vm15 = vweird.f32 %v4663_v59 }
 0x39f   : > { %3079 = vrcp.f32 %v1884_v42  ;;  %v1978_v46 = vsel %vm1975_vm12, %v1977_v7, %v1973_v1  ;;  %v2006_v31 = vand.u32 2147483647, %v1884_v42  ;;  %vm2002_vm1 = vweird.f32 %v1884_v42  ;;  %vm1988_vm6 = vmor %vm1986_vm2, %vm1987_vm15 }
 0x3a0   : > { %v1979_v47 = vmul.f32 %v4563_v22, %v1978_v46  ;;  %v1980_v34 = vmul.f32 %v4565_v54, %v1978_v46  ;;  %v1983_v11 = vsub.f32 1.0, %v1982_v20  ;;  %v2008_v54 = vand.u32 2147483648, %v1884_v42  ;;  %v1739_v63 = vpop.f32.mrf.mxu0  ;;  %v1780_v33 = vpop.f32.mrf.mxu1 }
 0x3a1   : > { %2078 = vmatmul.f32.gmra.mxu2 %v1733_v39  ;;  %2101 = vmatmul.f32.gmra.mxu3 %v1774_v14  ;;  %vm2007_vm5 = vcmp.eq.f32.partialorder %v2006_v31, 8.507059e+37  ;;  %v2409_v31 = vld [vmem:[#allocation8 + $0x18] sm:$0xff] }
 0x3a2   : > { %2119 = vmatpush.xpose.msra.mxu2 %v1979_v47  ;;  %2142 = vmatpush.xpose.msra.mxu3 %v1980_v34  ;;  %v1984_v16 = vmul.f32 %v4663_v59, %v1983_v11  ;;  %v2009_v53 = vor.u32 1.1754944e-38, %v2008_v54  ;;  %v2407_v54 = vld [vmem:[#allocation8 + $0x8] sm:$0xff] }
 0x3a4   : > { %v1985_v60 = vadd.f32 %v4663_v59, %v1984_v16 }
 0x3a5   : > { %v3080_v61 = vpop.eup %3079 }
 0x3a6   : > { %v1998_v49 = vmul.f32 %v3080_v61, %v1884_v42  ;;  %2120 = vmatpush.xpose.msra.mxu2 %v1963_v18  ;;  %2143 = vmatpush.xpose.msra.mxu3 %v1964_v48  ;;  %vm2003_vm14 = vweird.f32 %v3080_v61  ;;  %v1989_v21 = vsel %vm1988_vm6, %v4663_v59, %v1985_v60  ;;  %v2412_v60 = vld [vmem:[#allocation8 + $0x30] sm:$0xff] }
 0x3a7   : > { %vm2004_vm3 = vmor %vm2002_vm1, %vm2003_vm14  ;;  %v1994_v45 = vsel %vm1991_vm4, %v1993_v55, %v1989_v21  ;;  %v3098_v21 = vld [vmem:[%s3508_s27] sm:$0xff] }
 0x3a8   : > { %v1999_v22 = vsub.f32 1.0, %v1998_v49  ;;  %v1995_v32 = vmul.f32 %v4573_v41, %v1994_v45  ;;  %v1996_v57 = vmul.f32 %v4575_v15, %v1994_v45  ;;  %v1742_v52 = vpop.f32.mrf.mxu0  ;;  %v1783_v2 = vpop.f32.mrf.mxu1 }
 0x3a9   : > { %2121 = vmatmul.f32.vlgmr.msra.gmra.mxu2 %v1736_v23  ;;  %2144 = vmatmul.f32.vlgmr.msra.gmra.mxu3 %v1777_v9 }
 0x3aa   : > { %v2000_v17 = vmul.f32 %v3080_v61, %v1999_v22  ;;  %v2406_v22 = vld [vmem:[#allocation8] sm:$0xff] }
 0x3ac   : > { %v2001_v12 = vadd.f32 %v3080_v61, %v2000_v17  ;;  %v2408_v17 = vld [vmem:[#allocation8 + $0x10] sm:$0xff] }
 0x3ae   : > { %v2005_v29 = vsel %vm2004_vm3, %v3080_v61, %v2001_v12  ;;  %v2425_v12 = vpop.permute.xlu2 %2424 }
 0x3af   : > { %v2010_v27 = vsel %vm2007_vm5, %v2009_v53, %v2005_v29 }
 0x3b0   : > { %v2011_v36 = vmul.f32 %v4581_v24, %v2010_v27  ;;  %v2012_v19 = vmul.f32 %v4583_v5, %v2010_v27  ;;  %v1745_v41 = vpop.f32.mrf.mxu0  ;;  %v1786_v15 = vpop.f32.mrf.mxu1 }
 0x3b1   : > { %2124 = vmatmul.f32.gmra.mxu2 %v1739_v63  ;;  %2147 = vmatmul.f32.gmra.mxu3 %v1780_v33  ;;  %v2410_v63 = vld [vmem:[#allocation8 + $0x20] sm:$0xff]  ;;  %v2411_v33 = vld [vmem:[#allocation8 + $0x28] sm:$0xff]  ;;  %v2430_v45 = vpop.permute.xlu0 %2429 }
 0x3b2   : > { %2165 = vmatpush.xpose.msrb.mxu2 %v2011_v36  ;;  %2188 = vmatpush.xpose.msrb.mxu3 %v2012_v19  ;;  %v3099_v36 = vld [vmem:[%s3508_s27 + $0x8] sm:$0xff] }
 0x3b6   : > { %2166 = vmatpush.xpose.msrb.mxu2 %v1995_v32  ;;  %2189 = vmatpush.xpose.msrb.mxu3 %v1996_v57 }
 0x3b9   : > { %2167 = vmatmul.f32.vlgmr.msrb.gmra.mxu2 %v1742_v52  ;;  %2190 = vmatmul.f32.vlgmr.msrb.gmra.mxu3 %v1783_v2 }
 0x3ba   : > { %2270 = vmatpush.msra.mxu2 %v4597_v40  ;;  %2293 = vmatpush.msra.mxu3 %v4599_v8 }
 0x3bc   : > { %2271 = vmatpush.msra.mxu2 %v4590_v58  ;;  %2294 = vmatpush.msra.mxu3 %v4592_v6 }
 0x3be   : > { %2374 = vmatpush.msrb.mxu2 %v4623_v62  ;;  %2397 = vmatpush.msrb.mxu3 %v4625_v38 }
 0x3c0   : > { %2375 = vmatpush.msrb.mxu2 %v4619_v10  ;;  %2398 = vmatpush.msrb.mxu3 %v4621_v43 }
 0x3c1   : > { %2170 = vmatmul.f32.gmra.mxu2 %v1745_v41  ;;  %2193 = vmatmul.f32.gmra.mxu3 %v1786_v15  ;;  %v3100_v41 = vld [vmem:[%s3508_s27 + $0x10] sm:$0xff] }
 0x40c   : > { %v2030_v24 = vpop.f32.mrf.mxu2  ;;  %v2053_v5 = vpop.f32.mrf.mxu3 }
 0x40d   : > { %v2054_v40 = vadd.f32 %v2053_v5, %v2030_v24  ;;  %v3101_v24 = vld [vmem:[%s3508_s27 + $0x18] sm:$0xff] }
 0x40f   : > { %2860 = vmatmul.msk.f32.vlgmr.msra.gmra.mxu0 %vm2197_vm7, %v2054_v40  ;;  %2862 = vmatmul.msk.f32.vlgmr.msra.gmra.mxu1 %vm2197_vm7, %v2054_v40  ;;  %v2435_v40 = vpop.permute.xlu1 %2434 }
 0x414   : > { %v2033_v58 = vpop.f32.mrf.mxu2  ;;  %v2056_v6 = vpop.f32.mrf.mxu3 }
 0x415   : > { %v2057_v8 = vadd.f32 %v2056_v6, %v2033_v58 }
 0x417   : > { %2861 = vmatmul.msk.f32.gmra.mxu0 %vm2197_vm7, %v2057_v8  ;;  %2863 = vmatmul.msk.f32.gmra.mxu1 %vm2197_vm7, %v2057_v8 }
 0x41c   : > { %v2076_v10 = vpop.f32.mrf.mxu2  ;;  %v2099_v43 = vpop.f32.mrf.mxu3 }
 0x41d   : > { %v2100_v62 = vadd.f32 %v2099_v43, %v2076_v10  ;;  %v3102_v43 = vld [vmem:[%s3508_s27 + $0x20] sm:$0xff] }
 0x41f   : > { %2864 = vmatmul.msk.f32.vlgmr.msra.gmra.mxu2 %vm2197_vm7, %v2100_v62  ;;  %2866 = vmatmul.msk.f32.vlgmr.msra.gmra.mxu3 %vm2197_vm7, %v2100_v62 }
 0x424   : > { %v2079_v38 = vpop.f32.mrf.mxu2  ;;  %v2102_v30 = vpop.f32.mrf.mxu3 }
 0x425   : > { %v2103_v39 = vadd.f32 %v2102_v30, %v2079_v38  ;;  %v3103_v38 = vld [vmem:[%s3508_s27 + $0x28] sm:$0xff] }
 0x427   : > { %2865 = vmatmul.msk.f32.gmra.mxu2 %vm2197_vm7, %v2103_v39  ;;  %2867 = vmatmul.msk.f32.gmra.mxu3 %vm2197_vm7, %v2103_v39  ;;  %v2440_v39 = vpop.permute.xlu0 %2439 }
 0x42c   : > { %v2122_v14 = vpop.f32.mrf.mxu2  ;;  %v2145_v4 = vpop.f32.mrf.mxu3 }
 0x42d   : > { %v2146_v51 = vadd.f32 %v2145_v4, %v2122_v14 }
 0x42f   : > { %2868 = vmatmul.msk.f32.vlgmr.msrb.gmra.mxu0 %vm2197_vm7, %v2146_v51  ;;  %2870 = vmatmul.msk.f32.vlgmr.msrb.gmra.mxu1 %vm2197_vm7, %v2146_v51 }
 0x434   : > { %v2125_v13 = vpop.f32.mrf.mxu2  ;;  %v2148_v28 = vpop.f32.mrf.mxu3 }
 0x435   : > { %v2149_v0 = vadd.f32 %v2148_v28, %v2125_v13  ;;  %v3104_v28 = vld [vmem:[%s3508_s27 + $0x30] sm:$0xff] }
 0x437   : > { %2869 = vmatmul.msk.f32.gmra.mxu0 %vm2197_vm7, %v2149_v0  ;;  %2871 = vmatmul.msk.f32.gmra.mxu1 %vm2197_vm7, %v2149_v0 }
 0x43c   : > { %v2168_v50 = vpop.f32.mrf.mxu2  ;;  %v2191_v25 = vpop.f32.mrf.mxu3 }
 0x43d   : > { %v2192_v59 = vadd.f32 %v2191_v25, %v2168_v50  ;;  %v3105_v50 = vld [vmem:[%s3508_s27 + $0x38] sm:$0xff] }
 0x43f   : > { %2872 = vmatmul.msk.f32.vlgmr.msrb.gmra.mxu2 %vm2197_vm7, %v2192_v59  ;;  %2874 = vmatmul.msk.f32.vlgmr.msrb.gmra.mxu3 %vm2197_vm7, %v2192_v59  ;;  %v2445_v59 = vpop.permute.xlu2 %2444 }
 0x444   : > { %v2171_v37 = vpop.f32.mrf.mxu2  ;;  %v2194_v7 = vpop.f32.mrf.mxu3 }
 0x445   : > { %v2195_v42 = vadd.f32 %v2194_v7, %v2171_v37 }
 0x447   : > { %2873 = vmatmul.msk.f32.gmra.mxu2 %vm2197_vm7, %v2195_v42  ;;  %2875 = vmatmul.msk.f32.gmra.mxu3 %vm2197_vm7, %v2195_v42 }
 0x48c   : > { %v2221_v44 = vpop.f32.mrf.mxu0  ;;  %v2244_v3 = vpop.f32.mrf.mxu1 }
 0x494   : > { %v2224_v34 = vpop.f32.mrf.mxu0  ;;  %v2247_v23 = vpop.f32.mrf.mxu1 }
 0x4a2   : > { %v2273_v1 = vpop.f32.mrf.mxu2  ;;  %v2296_v20 = vpop.f32.mrf.mxu3 }
 0x4aa   : > { %v2276_v46 = vpop.f32.mrf.mxu2  ;;  %v2299_v47 = vpop.f32.mrf.mxu3 }
 0x4ac   : > { %v2325_v11 = vpop.f32.mrf.mxu0  ;;  %v2348_v61 = vpop.f32.mrf.mxu1 }
 0x4b4   : > { %v2328_v49 = vpop.f32.mrf.mxu0  ;;  %v2351_v16 = vpop.f32.mrf.mxu1 }
 0x4c2   : > { %v2377_v9 = vpop.f32.mrf.mxu2  ;;  %v2400_v35 = vpop.f32.mrf.mxu3 }
 0x4ca   : > { %v2380_v18 = vpop.f32.mrf.mxu2  ;;  %v2403_v48 = vpop.f32.mrf.mxu3 }
 0x4cb   : > { %2494 = vmatpush.msra.mxu0 %v2380_v18  ;;  %2535 = vmatpush.msra.mxu1 %v2403_v48  ;;  %v3109_v18 = vld [vmem:[%s3508_s27 + $0x58] sm:$0xff] }
 0x4cd   : > { %2495 = vmatpush.msra.mxu0 %v2377_v9  ;;  %2536 = vmatpush.msra.mxu1 %v2400_v35 }
 0x4cf   : > { %2496 = vmatpush.msra.mxu0 %v2328_v49  ;;  %2537 = vmatpush.msra.mxu1 %v2351_v16  ;;  %v2455_v49 = vpop.permute.xlu0 %2454 }
 0x4d1   : > { %2497 = vmatpush.msra.mxu0 %v2325_v11  ;;  %2538 = vmatpush.msra.mxu1 %v2348_v61  ;;  %v3108_v11 = vld [vmem:[%s3508_s27 + $0x50] sm:$0xff] }
 0x4d3   : > { %2498 = vmatpush.msra.mxu0 %v2276_v46  ;;  %2539 = vmatpush.msra.mxu1 %v2299_v47  ;;  %v2450_v47 = vpop.permute.xlu1 %2449 }
 0x4d5   : > { %2499 = vmatpush.msra.mxu0 %v2273_v1  ;;  %2540 = vmatpush.msra.mxu1 %v2296_v20  ;;  %v3106_v20 = vld [vmem:[%s3508_s27 + $0x40] sm:$0xff] }
 0x4d7   : > { %2500 = vmatpush.msra.mxu0 %v2224_v34  ;;  %2541 = vmatpush.msra.mxu1 %v2247_v23 }
 0x4d9   : > { %2501 = vmatpush.msra.mxu0 %v2221_v44  ;;  %2542 = vmatpush.msra.mxu1 %v2244_v3  ;;  %v3107_v3 = vld [vmem:[%s3508_s27 + $0x48] sm:$0xff] }
 0x4da   : > { %2876 = vmatmul.msk.f32.vlgmr.msra.gmra.mxu0 %vm511_vm0, %v2406_v22  ;;  %2884 = vmatmul.msk.f32.vlgmr.msra.gmra.mxu1 %vm511_vm0, %v2406_v22 }
 0x4e2   : > { %2877 = vmatmul.msk.f32.gmra.mxu0 %vm511_vm0, %v2407_v54  ;;  %2885 = vmatmul.msk.f32.gmra.mxu1 %vm511_vm0, %v2407_v54 }
 0x4ea   : > { %2878 = vmatmul.msk.f32.gmra.mxu0 %vm511_vm0, %v2408_v17  ;;  %2886 = vmatmul.msk.f32.gmra.mxu1 %vm511_vm0, %v2408_v17 }
 0x4f2   : > { %2879 = vmatmul.msk.f32.gmra.mxu0 %vm511_vm0, %v2409_v31  ;;  %2887 = vmatmul.msk.f32.gmra.mxu1 %vm511_vm0, %v2409_v31  ;;  %v3110_v31 = vld [vmem:[%s3508_s27 + $0x60] sm:$0xff] }
 0x4fa   : > { %2880 = vmatmul.msk.f32.gmra.mxu0 %vm511_vm0, %v2410_v63  ;;  %2888 = vmatmul.msk.f32.gmra.mxu1 %vm511_vm0, %v2410_v63 }
 0x502   : > { %2881 = vmatmul.msk.f32.gmra.mxu0 %vm511_vm0, %v2411_v33  ;;  %2889 = vmatmul.msk.f32.gmra.mxu1 %vm511_vm0, %v2411_v33  ;;  %v3111_v33 = vld [vmem:[%s3508_s27 + $0x68] sm:$0xff] }
 0x50a   : > { %2882 = vmatmul.msk.f32.gmra.mxu0 %vm511_vm0, %v2412_v60  ;;  %2890 = vmatmul.msk.f32.gmra.mxu1 %vm511_vm0, %v2412_v60 }
 0x512   : > { %2883 = vmatmul.msk.f32.gmra.mxu0 %vm511_vm0, %v2413_v26  ;;  %2891 = vmatmul.msk.f32.gmra.mxu1 %vm511_vm0, %v2413_v26  ;;  %v2460_v26 = vpop.permute.xlu2 %2459 }
 0x557   : > { %v2503_v53 = vpop.f32.mrf.mxu0  ;;  %v2544_v56 = vpop.f32.mrf.mxu1 }
 0x558   : > { %v2504_v29 = vadd.f32 %v2503_v53, %v2425_v12  ;;  %v2545_v27 = vadd.f32 %v2544_v56, %v2425_v12 }
 0x55a   : > { %v2568_v55 = vadd.f32 %v3098_v21, %v2504_v29  ;;  %v2569_v19 = vadd.f32 %v3099_v36, %v2545_v27  ;;  %v3112_v27 = vld [vmem:[%s3508_s27 + $0x70] sm:$0xff] }
 0x55c   : > { %2584 = vst [vmem:[%s4728_s8] sm:$0xff] %v2568_v55  ;;  %v3113_v55 = vld [vmem:[%s3508_s27 + $0x78] sm:$0xff] }
 0x55d   : > { %2585 = vst [vmem:[%s4728_s8 + $0x8] sm:$0xff] %v2569_v19 }
 0x55f   : > { %v2506_v32 = vpop.f32.mrf.mxu0  ;;  %v2547_v57 = vpop.f32.mrf.mxu1 }
 0x560   : > { %v2507_v52 = vadd.f32 %v2506_v32, %v2430_v45  ;;  %v2548_v2 = vadd.f32 %v2547_v57, %v2430_v45 }
 0x562   : > { %v2570_v15 = vadd.f32 %v3100_v41, %v2507_v52  ;;  %v2571_v5 = vadd.f32 %v3101_v24, %v2548_v2 }
 0x564   : > { %2586 = vst [vmem:[%s4728_s8 + $0x10] sm:$0xff] %v2570_v15 }
 0x565   : > { %2587 = vst [vmem:[%s4728_s8 + $0x18] sm:$0xff] %v2571_v5 }
 0x567   : > { %v2509_v58 = vpop.f32.mrf.mxu0  ;;  %v2550_v6 = vpop.f32.mrf.mxu1 }
 0x568   : > { %v2510_v8 = vadd.f32 %v2509_v58, %v2435_v40  ;;  %v2551_v10 = vadd.f32 %v2550_v6, %v2435_v40 }
 0x56a   : > { %v2572_v62 = vadd.f32 %v3102_v43, %v2510_v8  ;;  %v2573_v30 = vadd.f32 %v3103_v38, %v2551_v10 }
 0x56c   : > { %2588 = vst [vmem:[%s4728_s8 + $0x20] sm:$0xff] %v2572_v62 }
 0x56d   : > { %2589 = vst [vmem:[%s4728_s8 + $0x28] sm:$0xff] %v2573_v30 }
 0x56f   : > { %v2512_v14 = vpop.f32.mrf.mxu0  ;;  %v2553_v4 = vpop.f32.mrf.mxu1 }
 0x570   : > { %v2513_v51 = vadd.f32 %v2512_v14, %v2440_v39  ;;  %v2554_v13 = vadd.f32 %v2553_v4, %v2440_v39 }
 0x572   : > { %v2574_v0 = vadd.f32 %v3104_v28, %v2513_v51  ;;  %v2575_v25 = vadd.f32 %v3105_v50, %v2554_v13 }
 0x574   : > { %2590 = vst [vmem:[%s4728_s8 + $0x30] sm:$0xff] %v2574_v0 }
 0x575   : > { %2591 = vst [vmem:[%s4728_s8 + $0x38] sm:$0xff] %v2575_v25 }
 0x577   : > { %v2515_v37 = vpop.f32.mrf.mxu0  ;;  %v2556_v7 = vpop.f32.mrf.mxu1 }
 0x578   : > { %v2516_v42 = vadd.f32 %v2515_v37, %v2445_v59  ;;  %v2557_v1 = vadd.f32 %v2556_v7, %v2445_v59 }
 0x57a   : > { %v2576_v44 = vadd.f32 %v3106_v20, %v2516_v42  ;;  %v2577_v46 = vadd.f32 %v3107_v3, %v2557_v1 }
 0x57c   : > { %2592 = vst [vmem:[%s4728_s8 + $0x40] sm:$0xff] %v2576_v44 }
 0x57d   : > { %2593 = vst [vmem:[%s4728_s8 + $0x48] sm:$0xff] %v2577_v46 }
 0x57f   : > { %v2518_v34 = vpop.f32.mrf.mxu0  ;;  %v2559_v23 = vpop.f32.mrf.mxu1 }
 0x580   : > { %v2519_v9 = vadd.f32 %v2518_v34, %v2450_v47  ;;  %v2560_v35 = vadd.f32 %v2559_v23, %v2450_v47 }
 0x582   : > { %v2578_v61 = vadd.f32 %v3108_v11, %v2519_v9  ;;  %v2579_v48 = vadd.f32 %v3109_v18, %v2560_v35 }
 0x584   : > { %2594 = vst [vmem:[%s4728_s8 + $0x50] sm:$0xff] %v2578_v61 }
 0x585   : > { %2595 = vst [vmem:[%s4728_s8 + $0x58] sm:$0xff] %v2579_v48 }
 0x587   : > { %v2521_v16 = vpop.f32.mrf.mxu0  ;;  %v2562_v22 = vpop.f32.mrf.mxu1 }
 0x588   : > { %v2522_v54 = vadd.f32 %v2521_v16, %v2455_v49  ;;  %v2563_v17 = vadd.f32 %v2562_v22, %v2455_v49 }
 0x58a   : > { %v2580_v63 = vadd.f32 %v3110_v31, %v2522_v54  ;;  %v2581_v60 = vadd.f32 %v3111_v33, %v2563_v17 }
 0x58c   : > { %2596 = vst [vmem:[%s4728_s8 + $0x60] sm:$0xff] %v2580_v63 }
 0x58d   : > { %2597 = vst [vmem:[%s4728_s8 + $0x68] sm:$0xff] %v2581_v60 }
 0x58f   : > { %v2524_v12 = vpop.f32.mrf.mxu0  ;;  %v2565_v53 = vpop.f32.mrf.mxu1 }
 0x590   : > { %v2525_v56 = vadd.f32 %v2524_v12, %v2460_v26  ;;  %v2566_v29 = vadd.f32 %v2565_v53, %v2460_v26 }
 0x592   : > { %v2582_v21 = vadd.f32 %v3112_v27, %v2525_v56  ;;  %v2583_v36 = vadd.f32 %v3113_v55, %v2566_v29 }
 0x594   : > { %2598 = vst [vmem:[%s4728_s8 + $0x70] sm:$0xff] %v2582_v21 }
 0x595   : > { %2599 = vst [vmem:[%s4728_s8 + $0x78] sm:$0xff] %v2583_v36 }
 0x596   : > { %3261 = shalt.err (!%p3258_p9)
}
 0x597   : > { %s3322_s13 = smov 256   ;;  %s3323_s27 = smov 16  }
 0x598   : > { %2928 = dma.vmem_to_hbm [thread:$0]  (%p3445_p3), %s2614_s26, 2048, %s2616_s11, %s2601_s29, %s3322_s13, %s3322_s13, %s3323_s27  }
 0x599 PF: > { %s4874_s20 = sld [smem:[#allocation16_spill]]  ;;  %p4876_p12 = scmp.ge.s32.totalorder %s3312_s16, 2 }
 0x59b   : > { %p2945_p13 = pnand %p4876_p12, %p3414_p6 }
 0x59d   : > { %p2946_p0 = pneg %p2945_p13 }
 0x59f   : > { %s2630_s0 = sand.u32 1, %s4874_s20  }
 0x5a0   : > { %s2631_s8 = scalar_lea.sflag [#allocation4], %s2630_s0 }
 0x5a1   : > { %3295 = dma.done.wait (%p2946_p0), %s2631_s8, 2048  }
 0x5a2   : > { %3297 = vsyncadd (%p2946_p0), %s2631_s8, 4294965248  ;;  %s4877_s16 = sld [smem:[#allocation19_spill]]  ;;  %s4880_s13 = smov %s3304_s14 }
 0x5a3   : > { %s4878_s30 = sld [smem:[#allocation17_spill]] }
 0x5a4   : > { %s4879_s15 = sld [smem:[#allocation21_spill]] }
 0x5a8   : > { %p27_p5 = scmp.ge.s32.totalorder %s4877_s16, 4  }
 0x5a9   : > { %s4881_s14 = smov %s4878_s30 }
 0x5aa   :  { %29 = sbr.rel (!%p27_p5) target bundleno = 12 (0xc), region = 126 }
 0x5af   :  { %2637 = vsyncpa [#allocation3], 1 }
 0x5b0   :  { %2639 = vsyncpa [#allocation3 + $0x1], 1 }
 0x5b1   :  { %2640 = vsyncpa [#allocation6], 1 }
 0x5b2   :  { %2642 = vsyncpa [#allocation6 + $0x1], 1 }
 0x5b3   :  { %2643 = vsyncpa [#allocation9], 1 }
 0x5b4   :  { %2644 = vsyncpa [#allocation4], 1 }
 0x5b5   :  { %2646 = vsyncpa [#allocation4 + $0x1], 1 }

</bundles_post_ra>
